<compile_context>
chip_gen: v5e
topology: v5e:2x2
jax: 0.10.0
libtpu: 0.0.40
codegen_flags: <defaults>
</compile_context>

<pallas_src>
import numpy as np
import jax
import jax.numpy as jnp
from jax.experimental import pallas as pl
from jax.experimental.pallas import tpu as pltpu


def _round_up(x, m):
    return ((x + m - 1) // m) * m


# ----------------------------------------------------------------------------
# Static routing masks (host-side, built once): for internal node i
# (level-order index), selL[i, j] = 1 if leaf j is in the LEFT subtree of node
# i (factor p_i), selR[i, j] = 1 if leaf j is in the RIGHT subtree (factor
# 1 - p_i).  Leaf ordering matches the interleaving produced by SDT._forward.
# ----------------------------------------------------------------------------
def build_routing_masks(depth):
    n_internal = 2 ** depth - 1
    n_leaf = 2 ** depth
    selL = np.zeros((n_internal, n_leaf), np.float32)
    selR = np.zeros((n_internal, n_leaf), np.float32)
    for i in range(n_internal):
        level = int(np.floor(np.log2(i + 1)))
        pos = i - (2 ** level - 1)
        span = 2 ** (depth - level)
        start = pos * span
        half = span // 2
        selL[i, start:start + half] = 1.0
        selR[i, start + half:start + span] = 1.0
    return selL, selR


# ----------------------------------------------------------------------------
# One-time parameter preparation (outside the per-call hot path):
#   * split the bias column out of inner_nodes.weight, transpose the rest,
#   * pad node / leaf / class dims to multiples of 128 (lane-dense),
#   * cast the big weight to bf16,
#   * build padded routing masks: selL and selS = selL + selR (for the
#     softplus identity used in-kernel).
# ----------------------------------------------------------------------------
def prepare_sdt_params(w_inner, leaf_nodes, depth):
    n_internal = 2 ** depth - 1
    n_leaf = 2 ** depth
    out_dim = leaf_nodes.shape[1]
    n_pad = _round_up(n_internal, 128)
    l_pad = _round_up(n_leaf, 128)
    c_pad = _round_up(out_dim, 128)

    w = jnp.asarray(w_inner, jnp.float32)                        # (N, D+1)
    w_t = jnp.transpose(w[:, 1:])                                # (D, N)
    w_t = jnp.pad(w_t, ((0, 0), (0, n_pad - n_internal))).astype(jnp.bfloat16)
    bias = jnp.pad(w[:, 0][None, :], ((0, 0), (0, n_pad - n_internal)))  # (1, Npad) f32

    leaf = jnp.pad(jnp.asarray(leaf_nodes, jnp.float32),
                   ((0, l_pad - n_leaf), (0, c_pad - out_dim)))  # (Lpad, Cpad)

    selL_np, selR_np = build_routing_masks(depth)
    pad2 = ((0, n_pad - n_internal), (0, l_pad - n_leaf))
    selL = jnp.asarray(np.pad(selL_np, pad2))                    # (Npad, Lpad)
    selS = jnp.asarray(np.pad(selL_np + selR_np, pad2))          # (Npad, Lpad)
    return dict(w_t=w_t, bias=bias, leaf=leaf, selL=selL, selS=selS,
                out_dim=out_dim)


# ----------------------------------------------------------------------------
# Pallas kernel (per batch tile):
#   x_ref    : (TB, D)      f32    flattened input tile (cast to bf16 in-kernel)
#   w_ref    : (D, Npad)    bf16   inner_nodes weight (bias column removed), transposed
#   b_ref    : (1, Npad)    f32    inner_nodes bias row
#   selS_ref : (Npad, Lpad) f32    selL + selR
#   selL_ref : (Npad, Lpad) f32    left-subtree mask
#   leaf_ref : (Lpad, Cpad) f32    leaf_nodes (padded)
#   out_ref  : (TB, Cpad)   f32
# ----------------------------------------------------------------------------
def sdt_kernel(x_ref, w_ref, b_ref, selS_ref, selL_ref, leaf_ref, out_ref):
    # f32 -> bf16 cast on the VPU (hidden under the X DMA), then a bf16 MXU
    # matmul with f32 accumulation, plus the bias row.
    xb = x_ref[...].astype(jnp.bfloat16)
    z = jnp.dot(xb, w_ref[...], preferred_element_type=jnp.float32)
    z = z + b_ref[...]                                            # (TB, Npad) f32

    # Log-space routing: log p = -softplus(-z), log(1-p) = -softplus(z).
    # Using softplus(-z) = softplus(z) - z:
    #   -log mu = softplus(-z) @ selL + softplus(z) @ selR
    #           = softplus(z) @ (selL + selR) - z @ selL
    sp_pos = jnp.maximum(z, 0.0) + jnp.log(1.0 + jnp.exp(-jnp.abs(z)))  # softplus(z)

    neg_log_mu = (jnp.dot(sp_pos, selS_ref[...], preferred_element_type=jnp.float32)
                  - jnp.dot(z, selL_ref[...], preferred_element_type=jnp.float32))
    mu = jnp.exp(-neg_log_mu)                                     # (TB, Lpad)

    # y_pred = mu @ leaf_nodes   (soft_paths=True, eval mode).
    out_ref[...] = jnp.dot(mu, leaf_ref[...], preferred_element_type=jnp.float32)
    # TODO(synk): training-mode regularization penalty (_cal_penalty) is not
    # part of the eval forward output and is not computed here.


# ----------------------------------------------------------------------------
# Wrapper: flatten X (no dtype cast, no batch padding copy) and call the
# kernel on a 1-D "parallel" batch grid with a ragged-tolerant cdiv grid.
# ----------------------------------------------------------------------------
def sdt_forward(x, params, *, block_b=1024):
    assert block_b % 8 == 0, "block_b must be a multiple of 8 (sublane)"
    batch = x.shape[0]
    xf = x.reshape(batch, -1)                                     # X.view(B, -1), f32
    d = xf.shape[1]

    # Tile size: multiple of 8, <= block_b, and capped at ~ceil(batch/2) so the
    # grid has >= 2 steps (keeps both v7x TensorCores busy).
    tb = min(block_b, _round_up(max(pl.cdiv(batch, 2), 8), 8))
    grid = pl.cdiv(batch, tb)

    w_t, bias = params["w_t"], params["bias"]
    selS, selL, leaf = params["selS"], params["selL"], params["leaf"]
    n_pad = w_t.shape[1]
    l_pad, c_pad = leaf.shape

    out = pl.pallas_call(
        sdt_kernel,
        out_shape=jax.ShapeDtypeStruct((batch, c_pad), jnp.float32),
        grid=(grid,),
        in_specs=[
            pl.BlockSpec((tb, d), lambda i: (i, 0)),              # x: tiled batch
            pl.BlockSpec((d, n_pad), lambda i: (0, 0)),           # VMEM-resident
            pl.BlockSpec((1, n_pad), lambda i: (0, 0)),
            pl.BlockSpec((n_pad, l_pad), lambda i: (0, 0)),
            pl.BlockSpec((n_pad, l_pad), lambda i: (0, 0)),
            pl.BlockSpec((l_pad, c_pad), lambda i: (0, 0)),
        ],
        out_specs=pl.BlockSpec((tb, c_pad), lambda i: (i, 0)),    # lane-dense store
        compiler_params=pltpu.CompilerParams(
            dimension_semantics=("parallel",)),
    )(xf, w_t, bias, selS, selL, leaf)
    return out[:batch, :params["out_dim"]]


# ----------------------------------------------------------------------------
# Pure-JAX reference mirroring SDT._forward's layer-by-layer routing product,
# using the same numeric policy as the kernel (bf16 inputs for the dominant
# matmul, f32 everywhere else) so the check is tight.
# ----------------------------------------------------------------------------
def sdt_reference(x, w_inner, leaf_nodes, depth):
    batch = x.shape[0]
    xf = x.reshape(batch, -1)
    w = jnp.asarray(w_inner, jnp.float32)
    logits = jnp.dot(xf.astype(jnp.bfloat16),
                     jnp.transpose(w[:, 1:]).astype(jnp.bfloat16),
                     preferred_element_type=jnp.float32) + w[:, 0][None, :]
    p = jax.nn.sigmoid(logits)                                    # (B, N)
    mu = jnp.ones((batch, 1), jnp.float32)
    begin, end = 0, 1
    for layer in range(depth):
        pp = p[:, begin:end]                                      # (B, 2^l)
        pair = jnp.stack([pp, 1.0 - pp], axis=2)                  # (B, 2^l, 2)
        mu = (mu[:, :, None] * pair).reshape(batch, 2 ** (layer + 1))
        begin = end
        end = begin + 2 ** (layer + 1)
    return mu @ jnp.asarray(leaf_nodes, jnp.float32)


if __name__ == "__main__":
    # Small SDT-consistent shapes: NCHW image flattened to input_dim = C*H*W;
    # depth=5 (module default) -> 31 internal nodes / 32 leaves.
    batch, C, H, W = 256, 4, 16, 16
    input_dim = C * H * W
    output_dim = 10
    depth = 5
    n_internal = 2 ** depth - 1
    n_leaf = 2 ** depth

    key = jax.random.PRNGKey(0)
    kx, kw, kl = jax.random.split(key, 3)

    x = jax.random.normal(kx, (batch, C, H, W), dtype=jnp.float32)

    # Parameter shapes/init matching the module:
    #   inner_nodes: nn.Linear(input_dim+1, n_internal, bias=False),
    #                default init U(-1/sqrt(fan_in), 1/sqrt(fan_in))
    #   leaf_nodes : randn(n_leaf, output_dim)
    bound = 1.0 / np.sqrt(input_dim + 1)
    w_inner = jax.random.uniform(kw, (n_internal, input_dim + 1),
                                 dtype=jnp.float32, minval=-bound, maxval=bound)
    leaf_nodes = jax.random.normal(kl, (n_leaf, output_dim), dtype=jnp.float32)

    # One-time parameter prep (outside the per-call hot path).
    params = prepare_sdt_params(w_inner, leaf_nodes, depth)

    # Default block_b=1024 caps the tile at ceil(batch/2)=128 here, giving a
    # 2-step "parallel" grid (both v7x TensorCores get work).
    out = jax.block_until_ready(sdt_forward(x, params))

    ref = jax.block_until_ready(sdt_reference(x, w_inner, leaf_nodes, depth))
    np.testing.assert_allclose(np.asarray(out), np.asarray(ref),
                               rtol=2e-3, atol=2e-3)

    print("KERNEL_OK")
</pallas_src>

<mosaic_0001>
module attributes {stable_mosaic.version = 11 : i64} {
  func.func @sdt_kernel(%arg0: i32, %arg1: memref<128x1024xf32, #tpu.memory_space<vmem>>, %arg2: memref<1024x128xbf16, #tpu.memory_space<vmem>>, %arg3: memref<1x128xf32, #tpu.memory_space<vmem>>, %arg4: memref<128x128xf32, #tpu.memory_space<vmem>>, %arg5: memref<128x128xf32, #tpu.memory_space<vmem>>, %arg6: memref<128x128xf32, #tpu.memory_space<vmem>>, %arg7: memref<128x128xf32, #tpu.memory_space<vmem>>) attributes {dimension_semantics = [#tpu.dimension_semantics<parallel>], iteration_bounds = array<i64: 2>, scalar_prefetch = 0 : i64, scratch_operands = 0 : i64, tpu.core_type = #tpu.core_type<tc>, window_params = [{transform_indices = @transform_0, window_bounds = array<i64: 128, 1024>}, {pipeline_mode = #tpu.pipeline_mode<synchronous>, transform_indices = @transform_1, window_bounds = array<i64: 1024, 128>}, {pipeline_mode = #tpu.pipeline_mode<synchronous>, transform_indices = @transform_2, window_bounds = array<i64: 1, 128>}, {pipeline_mode = #tpu.pipeline_mode<synchronous>, transform_indices = @transform_3, window_bounds = array<i64: 128, 128>}, {pipeline_mode = #tpu.pipeline_mode<synchronous>, transform_indices = @transform_4, window_bounds = array<i64: 128, 128>}, {pipeline_mode = #tpu.pipeline_mode<synchronous>, transform_indices = @transform_5, window_bounds = array<i64: 128, 128>}, {transform_indices = @transform_6, window_bounds = array<i64: 128, 128>}]} {
    %c0 = arith.constant 0 : index
    %c0_0 = arith.constant 0 : index
    %0 = vector.load %arg1[%c0, %c0_0] : memref<128x1024xf32, #tpu.memory_space<vmem>>, vector<128x1024xf32>
    %1 = arith.truncf %0 : vector<128x1024xf32> to vector<128x1024xbf16>
    %c0_1 = arith.constant 0 : index
    %c0_2 = arith.constant 0 : index
    %2 = vector.load %arg2[%c0_1, %c0_2] : memref<1024x128xbf16, #tpu.memory_space<vmem>>, vector<1024x128xbf16>
    %cst = arith.constant dense<0.000000e+00> : vector<128x128xf32>
    %3 = tpu.matmul %1, %2, %cst {dimension_numbers = #tpu.dot_dimension_numbers<[1], [0], [0], [1], [0, 0, 1, 1], [], []>} : vector<128x1024xbf16>, vector<1024x128xbf16>, vector<128x128xf32> -> vector<128x128xf32>
    %c0_3 = arith.constant 0 : index
    %c0_4 = arith.constant 0 : index
    %4 = vector.load %arg3[%c0_3, %c0_4] : memref<1x128xf32, #tpu.memory_space<vmem>>, vector<1x128xf32>
    %5 = vector.broadcast %4 : vector<1x128xf32> to vector<128x128xf32>
    %6 = arith.addf %3, %5 : vector<128x128xf32>
    %cst_5 = arith.constant 0.000000e+00 : f32
    %7 = vector.broadcast %cst_5 : f32 to vector<128x128xf32>
    %8 = arith.maximumf %6, %7 : vector<128x128xf32>
    %9 = math.absf %6 : vector<128x128xf32>
    %cst_6 = arith.constant 0.000000e+00 : f32
    %10 = vector.broadcast %cst_6 : f32 to vector<128x128xf32>
    %11 = arith.subf %10, %9 : vector<128x128xf32>
    %12 = math.exp %11 : vector<128x128xf32>
    %cst_7 = arith.constant 1.000000e+00 : f32
    %13 = vector.broadcast %cst_7 : f32 to vector<128x128xf32>
    %14 = arith.addf %13, %12 : vector<128x128xf32>
    %15 = math.log %14 : vector<128x128xf32>
    %16 = arith.addf %8, %15 : vector<128x128xf32>
    %c0_8 = arith.constant 0 : index
    %c0_9 = arith.constant 0 : index
    %17 = vector.load %arg4[%c0_8, %c0_9] : memref<128x128xf32, #tpu.memory_space<vmem>>, vector<128x128xf32>
    %cst_10 = arith.constant dense<0.000000e+00> : vector<128x128xf32>
    %18 = tpu.matmul %16, %17, %cst_10 {dimension_numbers = #tpu.dot_dimension_numbers<[1], [0], [0], [1], [0, 0, 1, 1], [], []>} : vector<128x128xf32>, vector<128x128xf32>, vector<128x128xf32> -> vector<128x128xf32>
    %c0_11 = arith.constant 0 : index
    %c0_12 = arith.constant 0 : index
    %19 = vector.load %arg5[%c0_11, %c0_12] : memref<128x128xf32, #tpu.memory_space<vmem>>, vector<128x128xf32>
    %cst_13 = arith.constant dense<0.000000e+00> : vector<128x128xf32>
    %20 = tpu.matmul %6, %19, %cst_13 {dimension_numbers = #tpu.dot_dimension_numbers<[1], [0], [0], [1], [0, 0, 1, 1], [], []>} : vector<128x128xf32>, vector<128x128xf32>, vector<128x128xf32> -> vector<128x128xf32>
    %21 = arith.subf %18, %20 : vector<128x128xf32>
    %cst_14 = arith.constant 0.000000e+00 : f32
    %22 = vector.broadcast %cst_14 : f32 to vector<128x128xf32>
    %23 = arith.subf %22, %21 : vector<128x128xf32>
    %24 = math.exp %23 : vector<128x128xf32>
    %c0_15 = arith.constant 0 : index
    %c0_16 = arith.constant 0 : index
    %25 = vector.load %arg6[%c0_15, %c0_16] : memref<128x128xf32, #tpu.memory_space<vmem>>, vector<128x128xf32>
    %cst_17 = arith.constant dense<0.000000e+00> : vector<128x128xf32>
    %26 = tpu.matmul %24, %25, %cst_17 {dimension_numbers = #tpu.dot_dimension_numbers<[1], [0], [0], [1], [0, 0, 1, 1], [], []>} : vector<128x128xf32>, vector<128x128xf32>, vector<128x128xf32> -> vector<128x128xf32>
    %c0_18 = arith.constant 0 : index
    %c0_19 = arith.constant 0 : index
    %27 = vector.load %arg7[%c0_18, %c0_19] : memref<128x128xf32, #tpu.memory_space<vmem>>, vector<128x128xf32>
    tpu.vector_store %arg7[%c0_18, %c0_19], %26 {strides = array<i32>} : memref<128x128xf32, #tpu.memory_space<vmem>>, vector<128x128xf32>,
    return
  }
  func.func @transform_0(%arg0: i32) -> (i32, i32) {
    %c0_i32 = arith.constant 0 : i32
    %c0_i32_0 = arith.constant 0 : i32
    return %arg0, %c0_i32 : i32, i32
  }
  func.func @transform_1(%arg0: i32) -> (i32, i32) {
    %c0_i32 = arith.constant 0 : i32
    %c0_i32_0 = arith.constant 0 : i32
    %c0_i32_1 = arith.constant 0 : i32
    return %c0_i32, %c0_i32_0 : i32, i32
  }
  func.func @transform_2(%arg0: i32) -> (i32, i32) {
    %c0_i32 = arith.constant 0 : i32
    %c0_i32_0 = arith.constant 0 : i32
    %c0_i32_1 = arith.constant 0 : i32
    return %c0_i32, %c0_i32_0 : i32, i32
  }
  func.func @transform_3(%arg0: i32) -> (i32, i32) {
    %c0_i32 = arith.constant 0 : i32
    %c0_i32_0 = arith.constant 0 : i32
    %c0_i32_1 = arith.constant 0 : i32
    return %c0_i32, %c0_i32_0 : i32, i32
  }
  func.func @transform_4(%arg0: i32) -> (i32, i32) {
    %c0_i32 = arith.constant 0 : i32
    %c0_i32_0 = arith.constant 0 : i32
    %c0_i32_1 = arith.constant 0 : i32
    return %c0_i32, %c0_i32_0 : i32, i32
  }
  func.func @transform_5(%arg0: i32) -> (i32, i32) {
    %c0_i32 = arith.constant 0 : i32
    %c0_i32_0 = arith.constant 0 : i32
    %c0_i32_1 = arith.constant 0 : i32
    return %c0_i32, %c0_i32_0 : i32, i32
  }
  func.func @transform_6(%arg0: i32) -> (i32, i32) {
    %c0_i32 = arith.constant 0 : i32
    %c0_i32_0 = arith.constant 0 : i32
    return %arg0, %c0_i32 : i32, i32
  }
}

</mosaic_0001>

<bundles_post_ra>
// kernel: tpu_custom_call.1
= control target key start
LH: loop header
LB: loop body
LE: loop exit
PB: predicated region body
PF: predicated region fallthrough
CT: control target
= control target key end

     0   :  { %11 = vsyncpa [#allocation3], 0  ;;  %s3446_s0 = inlined_call_operand.hbm [shape: f32[256,1024], index: 0, kind: input, shape index: {}]   ;;  %s3447_s1 = inlined_call_operand.hbm [shape: bf16[1024,128], index: 1, kind: input, shape index: {}]   ;;  %s3448_s2 = inlined_call_operand.vmem [shape: f32[1,128], index: 2, kind: input, shape index: {}]   ;;  %s3449_s3 = inlined_call_operand.hbm [shape: f32[128,128], index: 3, kind: input, shape index: {}]   ;;  %s3450_s4 = inlined_call_operand.hbm [shape: f32[128,128], index: 4, kind: input, shape index: {}]   ;;  %s3451_s5 = inlined_call_operand.hbm [shape: f32[128,128], index: 5, kind: input, shape index: {}]   ;;  %s3452_s6 = inlined_call_operand.hbm [shape: f32[256,128], index: 6, kind: output, shape index: {}]  }
   0x1   :  { %13 = vsyncpa [#allocation3 + $0x1], 0 }
   0x2   :  { %14 = vsyncpa [#allocation6], 0 }
   0x3   :  { %15 = vsyncpa [#allocation9], 0 }
   0x4   :  { %16 = vsyncpa [#allocation4], 0 }
   0x5   :  { %18 = vsyncpa [#allocation4 + $0x1], 0  ;;  %s2868_s21 = smov 0   ;;  %s2870_s22 = smov 0  }
   0x6   :  { %s2872_s23 = smov 0   ;;  %s2874_s24 = smov 0  }
   0x7 LB: > { %s2889_s25 = sadd.s32 4294967295, %s2820_s24   ;;  %s2035_s26 = sadd.s32 4294967294, %s2820_s24   ;;  %s2820_s24 = sphi %s2874_s24, %s3465_s24   ;;  %s2816_s23 = sphi %s2872_s23, %s3464_s23   ;;  %s2812_s22 = sphi %s2870_s22, %s3463_s22   ;;  %s2808_s21 = sphi %s2868_s21, %s3462_s21  }
   0x8   : > { %p44_p0 = scmp.ne.s32.totalorder %s2812_s22, %s2808_s21  ;;  %p45_p1 = scmp.eq.s32.totalorder %s2889_s25, 0 }
   0x9   : > { %p173_p2 = scmp.eq.s32.totalorder %s2889_s25, 1  ;;  %p179_p3 = scmp.eq.s32.totalorder %s2035_s26, 1 }
   0xa   : > { %p2898_p4 = por %p45_p1, %p44_p0  ;;  %p2036_p5 = scmp.ge.s32.totalorder %s2820_s24, 1 }
   0xb   : > { %p2903_p6 = por %p179_p3, %p44_p0  ;;  %p186_p7 = scmp.lt.s32.totalorder %s2820_s24, 3 }
   0xc   : > { %s197_s7 = sshll.u32 %s3447_s1, 4  ;;  %s2822_s9 = smov [#allocation5]   ;;  %s198_s7 = int_to_ptr.hbm [resolvable:$true] %s197_s7 }
   0xd   : > { %p2911_p8 = pnand %p2036_p5, %p186_p7  ;;  %s199_s10 = sshll.u32 %s2822_s9, 4  ;;  %s200_s10 = int_to_ptr.vmem [resolvable:$true] %s199_s10 }
   0xe   : > { %s228_s14 = sshll.u32 %s3450_s4, 4  ;;  %s3453_s15 = smov 64   ;;  %s229_s14 = int_to_ptr.hbm [resolvable:$true] %s228_s14 }
   0xf   : > { %p2425_p9 = pneg %p2911_p8  ;;  %s2824_s16 = smov 4  }
  0x10   : > { %s2825_s17 = smov [#allocation8]   ;;  %s214_s26 = sshll.u32 %s3449_s3, 4  ;;  %s215_s26 = int_to_ptr.hbm [resolvable:$true] %s214_s26 }
  0x11   : > { %p2919_p10 = pnand %p2425_p9, %p45_p1  ;;  %s230_s18 = sshll.u32 %s2825_s17, 4  ;;  %s231_s18 = int_to_ptr.vmem [resolvable:$true] %s230_s18 }
  0x12   : > { %s2826_s29 = smov 128   ;;  %s2827_s30 = smov 8  }
  0x13   : > { %2428 = dma.hbm_to_vmem [thread:$0]  (!%p2919_p10), %s198_s7, 8192, %s200_s10, [#allocation6], %s3453_s15, %s3453_s15, %s2824_s16  }
  0x14   : > { %2434 = dma.hbm_to_vmem [thread:$0]  (!%p2919_p10), %s229_s14, 2048, %s231_s18, [#allocation9], %s2826_s29, %s2826_s29, %s2827_s30  }
  0x15   : > { %s242_s10 = sshll.u32 %s3451_s5, 4  ;;  %s2828_s12 = smov [#allocation7]   ;;  %s243_s10 = int_to_ptr.hbm [resolvable:$true] %s242_s10 }
  0x16   : > { %s216_s13 = sshll.u32 %s2828_s12, 4  ;;  %s2829_s16 = smov [#allocation10]   ;;  %s217_s13 = int_to_ptr.vmem [resolvable:$true] %s216_s13 }
  0x17   : > { %2431 = dma.hbm_to_vmem [thread:$0]  (!%p2919_p10), %s215_s26, 2048, %s217_s13, [#allocation6], %s2826_s29, %s2826_s29, %s2827_s30  }
  0x18   : > { %s244_s17 = sshll.u32 %s2829_s16, 4  ;;  %s2944_s14 = sadd.s32 1, %s2820_s24   ;;  %s245_s17 = int_to_ptr.vmem [resolvable:$true] %s244_s17 }
  0x19   : > { %2437 = dma.hbm_to_vmem [thread:$0]  (!%p2919_p10), %s243_s10, 2048, %s245_s17, [#allocation9], %s2826_s29, %s2826_s29, %s2827_s30  }
  0x1a   : > { %s31_s18 = sadd.s32 1, %s2816_s23  ;;  %s28_s19 = ssub.s32 %s2820_s24, %s2944_s14 }
  0x1b   : > { %p38_p12 = scmp.ne.s32.totalorder %s2816_s23, %s2812_s22  ;;  %p29_p13 = scmp.eq.s32.totalorder %s28_s19, 0 }
  0x1c   : > { %p39_p0 = scmp.eq.s32.totalorder %s2820_s24, 0  ;;  %p2450_p5 = scmp.lt.s32.totalorder %s2820_s24, 2 }
  0x1d   : > { %p2954_p3 = por %p173_p2, %p38_p12  ;;  %s258_s7 = sand.u32 1, %s2816_s23  }
  0x1e   : > { %s2960_s26 = scalar_select %p29_p13, %s2816_s23, %s31_s18  }
  0x1f   : > { %p40_p7 = por %p39_p0, %p38_p12  ;;  %s2042_s11 = sshll.u32 %s258_s7, 10 }
  0x20   : > { %s2315_s29 = sshll.u32 %s2820_s24, 10  ;;  %s262_s12 = scalar_lea.vmem [#allocation2], %s2042_s11 }
  0x21   : > { %s268_s10 = scalar_lea.hbm %s3446_s0, %s2315_s29  ;;  %s271_s13 = sshll.u32 %s262_s12, 4  ;;  %s272_s13 = int_to_ptr.vmem [resolvable:$true] %s271_s13 }
  0x22   : > { %s269_s16 = sshll.u32 %s268_s10, 4  ;;  %p2967_p2 = pnand %p2450_p5, %p40_p7  ;;  %s270_s16 = int_to_ptr.hbm [resolvable:$true] %s269_s16 }
  0x23   : > { %s259_s18 = scalar_lea.sflag [#allocation3], %s258_s7  ;;  %s2716_s19 = sshra.s32 %s270_s16, 4  ;;  %s2717_s19 = int_to_ptr.hbm [resolvable:$true] %s2716_s19 }
  0x24   : > { %s2718_s15 = scalar_lea.hbm %s2717_s19, 1024  ;;  %p2720_p10 = pneg %p2967_p2 }
  0x25   : > { %p2719_p9 = scmp.ne.s32.totalorder %s2717_s19, %s2718_s15  ;;  %s2723_s30 = scalar_lea.hbm %s3446_s0, 2048 }
  0x26   : > { %p2724_p0 = scmp.lt.s32.totalorder %s2717_s19, %s3446_s0  ;;  %p2725_p5 = scmp.lt.s32.totalorder %s2723_s30, %s2718_s15 }
  0x27   : > { %p2721_p12 = pnand %p2720_p10, %p2719_p9 }
  0x28   : > { %p2726_p7 = por %p2725_p5, %p2724_p0 }
  0x29   : > { %p2722_p13 = pneg %p2721_p12 }
  0x2b   : > { %p2727_p11 = pnand %p2726_p7, %p2722_p13 }
  0x2d   : > { %2730 = shalt.err (!%p2727_p11)
}
  0x2e   : > { %s2830_s7 = smov 1024   ;;  %s3460_s12 = smov 64  }
  0x2f   : > { %2441 = dma.hbm_to_vmem [thread:$0]  (!%p2967_p2), %s270_s16, 16384, %s272_s13, %s259_s18, %s2830_s7, %s2830_s7, %s3460_s12  }
  0x30   : > { %283 = sbr.rel (%p2911_p8) target bundleno = 869 (0x365), region = 44  ;;  %s2985_s29 = sand.u32 (!%p2911_p8), 1, %s2812_s22  }
  0x31   : > { %s2047_s11 = sshll.u32 (!%p2911_p8), %s2985_s29, 10  ;;  %s286_s19 = scalar_lea.sflag (!%p2911_p8), [#allocation3], %s2985_s29 }
  0x32   : > { %s2989_s15 = scalar_lea.vmem (!%p2911_p8), [#allocation2], %s2047_s11 }
  0x35   : > { %2791 = dma.done.wait (%p2898_p4), %s286_s19, 16384  }
  0x36   : > { %2793 = vsyncadd (%p2898_p4), %s286_s19, 4294950912 }
  0x37   : > { %2795 = dma.done.wait (%p45_p1), [#allocation6], 10240  }
  0x38   : > { %2797 = vsyncadd (%p45_p1), [#allocation6], 4294957056 }
  0x39   : > { %2799 = dma.done.wait (%p45_p1), [#allocation9], 4096  }
  0x3a   : > { %2801 = vsyncadd (%p45_p1), [#allocation9], 4294963200  ;;  %v2323_v0 = vld [vmem:[#allocation5 + $0x38] sm:$0xff]  ;;  %v2322_v3 = vld [vmem:[#allocation5 + $0x30] sm:$0xff]  ;;  %s2052_s13 = sshll.u32 %s2985_s29, 7  ;;  %s2380_s17 = sshll.u32 %s2889_s25, 7 }
  0x3b   : > { %v3003_v1 = vld [vmem:[#allocation5 + $0xb8] sm:$0xff]  ;;  %2381 = vmatpush.bf16.msra.mxu3 %v2323_v0  ;;  %v3008_v4 = vld [vmem:[#allocation5 + $0xb0] sm:$0xff]  ;;  %1049 = vmatpush.bf16.msra.mxu0 %v2323_v0  ;;  %v2321_v6 = vld [vmem:[#allocation5 + $0x28] sm:$0xff]  ;;  %s3394_s16 = scalar_lea.vmem [#allocation11], %s2052_s13  ;;  %s1920_s9 = scalar_lea.hbm %s3452_s6, %s2380_s17 }
  0x3c   : > { %v3005_v2 = vld [vmem:[#allocation5 + $0x78] sm:$0xff]  ;;  %2397 = vmatpush.bf16.msra.mxu2 %v3003_v1  ;;  %v3011_v5 = vld [vmem:[#allocation5 + $0x70] sm:$0xff]  ;;  %v3014_v7 = vld [vmem:[#allocation5 + $0xa8] sm:$0xff]  ;;  %s1921_s10 = sshll.u32 %s3394_s16, 4  ;;  %s1923_s7 = sshll.u32 %s1920_s9, 4  ;;  %s1922_s10 = int_to_ptr.vmem [resolvable:$true] %s1921_s10  ;;  %s1924_s7 = int_to_ptr.hbm [resolvable:$true] %s1923_s7 }
  0x3d   : > { %2389 = vmatpush.bf16.msra.mxu1 %v3005_v2  ;;  %v3017_v8 = vld [vmem:[#allocation5 + $0x68] sm:$0xff]  ;;  %v2320_v9 = vld [vmem:[#allocation5 + $0x20] sm:$0xff]  ;;  %v2319_v12 = vld [vmem:[#allocation5 + $0x18] sm:$0xff]  ;;  %s1909_s12 = scalar_lea.sflag [#allocation4], %s2985_s29  ;;  %s2760_s11 = sshra.s32 %s1924_s7, 4  ;;  %s2761_s11 = int_to_ptr.hbm [resolvable:$true] %s2760_s11 }
  0x3e   : > { %v3020_v10 = vld [vmem:[#allocation5 + $0xa0] sm:$0xff]  ;;  %v3026_v13 = vld [vmem:[#allocation5 + $0x98] sm:$0xff]  ;;  %v2318_v15 = vld [vmem:[#allocation5 + $0x10] sm:$0xff]  ;;  %s2762_s19 = scalar_lea.hbm %s2761_s11, 128  ;;  %s2766_s27 = scalar_lea.hbm %s3452_s6, 256 }
  0x3f   : > { %2382 = vmatpush.bf16.msra.mxu3 %v2322_v3  ;;  %1050 = vmatpush.bf16.msra.mxu0 %v2322_v3  ;;  %v3023_v11 = vld [vmem:[#allocation5 + $0x60] sm:$0xff]  ;;  %v3029_v14 = vld [vmem:[#allocation5 + $0x58] sm:$0xff]  ;;  %v3032_v16 = vld [vmem:[#allocation5 + $0x90] sm:$0xff]  ;;  %p2763_p1 = scmp.ne.s32.totalorder %s2761_s11, %s2762_s19  ;;  %p2767_p11 = scmp.lt.s32.totalorder %s2761_s11, %s3452_s6 }
  0x40   : > { %2398 = vmatpush.bf16.msra.mxu2 %v3008_v4  ;;  %v3035_v17 = vld [vmem:[#allocation5 + $0x50] sm:$0xff]  ;;  %v2317_v18 = vld [vmem:[#allocation5 + $0x8] sm:$0xff]  ;;  %v2316_v21 = vld [vmem:[#allocation5] sm:$0xff]  ;;  %p2768_p2 = scmp.lt.s32.totalorder %s2766_s27, %s2762_s19 }
  0x41   : > { %2390 = vmatpush.bf16.msra.mxu1 %v3011_v5  ;;  %v3038_v19 = vld [vmem:[#allocation5 + $0x88] sm:$0xff]  ;;  %v373_v22 = vld [vmem:[%s2989_s15 + $0x100] sm:$0xff]  ;;  %v375_v25 = vld [vmem:[%s2989_s15 + $0x110] sm:$0xff]  ;;  %p2764_p4 = pnand %p2763_p1, %p2954_p3 }
  0x42   : > { %v2325_v20 = vld [vmem:[#allocation5 + $0x48] sm:$0xff]  ;;  %v381_v23 = vld [vmem:[%s2989_s15 + $0x140] sm:$0xff]  ;;  %v383_v26 = vld [vmem:[%s2989_s15 + $0x150] sm:$0xff]  ;;  %p2769_p9 = por %p2768_p2, %p2767_p11 }
  0x43   : > { %2383 = vmatpush.bf16.msra.mxu3 %v2321_v6  ;;  %1051 = vmatpush.bf16.msra.mxu0 %v2321_v6  ;;  %v3044_v24 = vld [vmem:[#allocation5 + $0x80] sm:$0xff]  ;;  %v2347_v27 = vld [vmem:[#allocation5 + $0xf8] sm:$0xff]  ;;  %v374_v31 = vld [vmem:[%s2989_s15 + $0x108] sm:$0xff]  ;;  %v485_v33 = vpack.c.bf16 %v381_v23, %v373_v22  ;;  %v487_v34 = vpack.c.bf16 %v383_v26, %v375_v25  ;;  %p2765_p8 = pneg %p2764_p4 }
  0x44   : > { %2399 = vmatpush.bf16.msra.mxu2 %v3014_v7  ;;  %v341_v28 = vld [vmem:[%s2989_s15] sm:$0xff]  ;;  %v382_v32 = vld [vmem:[%s2989_s15 + $0x148] sm:$0xff]  ;;  %v2346_v37 = vld [vmem:[#allocation5 + $0xf0] sm:$0xff] }
  0x45   : > { %2391 = vmatpush.bf16.msra.mxu1 %v3017_v8  ;;  %v349_v29 = vld [vmem:[%s2989_s15 + $0x40] sm:$0xff]  ;;  %v486_v36 = vpack.c.bf16 %v382_v32, %v374_v31  ;;  %v2345_v38 = vld [vmem:[#allocation5 + $0xe8] sm:$0xff]  ;;  %v391_v42 = vld [vmem:[%s2989_s15 + $0x190] sm:$0xff]  ;;  %p2770_p10 = pnand %p2769_p9, %p2765_p8 }
  0x46   : > { %v2324_v30 = vld [vmem:[#allocation5 + $0x40] sm:$0xff]  ;;  %v469_v35 = vpack.c.bf16 %v349_v29, %v341_v28  ;;  %v399_v43 = vld [vmem:[%s2989_s15 + $0x1d0] sm:$0xff]  ;;  %v390_v46 = vld [vmem:[%s2989_s15 + $0x188] sm:$0xff] }
  0x47   : > { %2384 = vmatpush.bf16.msra.mxu3 %v2320_v9  ;;  %1052 = vmatpush.bf16.msra.mxu0 %v2320_v9  ;;  %v2344_v39 = vld [vmem:[#allocation5 + $0xe0] sm:$0xff]  ;;  %v398_v47 = vld [vmem:[%s2989_s15 + $0x1c8] sm:$0xff]  ;;  %v495_v49 = vpack.c.bf16 %v399_v43, %v391_v42  ;;  %v2343_v52 = vld [vmem:[#allocation5 + $0xd8] sm:$0xff] }
  0x48   : > { %2400 = vmatpush.bf16.msra.mxu2 %v3020_v10  ;;  %v389_v40 = vld [vmem:[%s2989_s15 + $0x180] sm:$0xff]  ;;  %v494_v51 = vpack.c.bf16 %v398_v47, %v390_v46  ;;  %v2342_v53 = vld [vmem:[#allocation5 + $0xd0] sm:$0xff]  ;;  %v342_v58 = vld [vmem:[%s2989_s15 + $0x8] sm:$0xff] }
  0x49   : > { %2392 = vmatpush.bf16.msra.mxu1 %v3023_v11  ;;  %v397_v41 = vld [vmem:[%s2989_s15 + $0x1c0] sm:$0xff]  ;;  %v407_v56 = vld [vmem:[%s2989_s15 + $0x210] sm:$0xff]  ;;  %v350_v59 = vld [vmem:[%s2989_s15 + $0x48] sm:$0xff] }
  0x4a   : > { %v357_v44 = vld [vmem:[%s2989_s15 + $0x80] sm:$0xff]  ;;  %v493_v48 = vpack.c.bf16 %v397_v41, %v389_v40  ;;  %v415_v57 = vld [vmem:[%s2989_s15 + $0x250] sm:$0xff]  ;;  %v406_v60 = vld [vmem:[%s2989_s15 + $0x208] sm:$0xff]  ;;  %v470_v0 = vpack.c.bf16 %v350_v59, %v342_v58 }
  0x4b   : > { %2385 = vmatpush.bf16.msra.mxu3 %v2319_v12  ;;  %1053 = vmatpush.bf16.msra.mxu0 %v2319_v12  ;;  %v365_v45 = vld [vmem:[%s2989_s15 + $0xc0] sm:$0xff]  ;;  %v414_v61 = vld [vmem:[%s2989_s15 + $0x248] sm:$0xff]  ;;  %v503_v63 = vpack.c.bf16 %v415_v57, %v407_v56  ;;  %v2371_v3 = vld [vmem:[#allocation5 + $0x1b8] sm:$0xff] }
  0x4c   : > { %2401 = vmatpush.bf16.msra.mxu2 %v3026_v13  ;;  %v477_v50 = vpack.c.bf16 %v365_v45, %v357_v44  ;;  %v405_v54 = vld [vmem:[%s2989_s15 + $0x200] sm:$0xff]  ;;  %v2363_v6 = vld [vmem:[#allocation5 + $0x178] sm:$0xff]  ;;  %v2369_v9 = vld [vmem:[#allocation5 + $0x1a8] sm:$0xff] }
  0x4d   : > { %2393 = vmatpush.bf16.msra.mxu1 %v3029_v14  ;;  %v413_v55 = vld [vmem:[%s2989_s15 + $0x240] sm:$0xff]  ;;  %v2355_v28 = vld [vmem:[#allocation5 + $0x138] sm:$0xff]  ;;  %v2366_v31 = vld [vmem:[#allocation5 + $0x190] sm:$0xff] }
  0x4e   : > { %v501_v62 = vpack.c.bf16 %v413_v55, %v405_v54  ;;  %v429_v12 = vld [vmem:[%s2989_s15 + $0x2c0] sm:$0xff]  ;;  %v2359_v29 = vld [vmem:[#allocation5 + $0x158] sm:$0xff]  ;;  %v2365_v42 = vld [vmem:[#allocation5 + $0x188] sm:$0xff] }
  0x4f   : > { %2386 = vmatpush.bf16.msra.mxu3 %v2318_v15  ;;  %1054 = vmatpush.bf16.msra.mxu0 %v2318_v15  ;;  %v431_v15 = vld [vmem:[%s2989_s15 + $0x2d0] sm:$0xff]  ;;  %v2368_v26 = vld [vmem:[#allocation5 + $0x1a0] sm:$0xff]  ;;  %v2353_v44 = vld [vmem:[#allocation5 + $0x128] sm:$0xff] }
  0x50   : > { %2402 = vmatpush.bf16.msra.mxu2 %v3032_v16  ;;  %v445_v32 = vld [vmem:[%s2989_s15 + $0x340] sm:$0xff]  ;;  %v2357_v45 = vld [vmem:[#allocation5 + $0x148] sm:$0xff]  ;;  %v359_v54 = vld [vmem:[%s2989_s15 + $0x90] sm:$0xff] }
  0x51   : > { %2394 = vmatpush.bf16.msra.mxu1 %v3035_v17  ;;  %v2364_v46 = vld [vmem:[#allocation5 + $0x180] sm:$0xff]  ;;  %v367_v55 = vld [vmem:[%s2989_s15 + $0xd0] sm:$0xff]  ;;  %v454_v56 = vld [vmem:[%s2989_s15 + $0x388] sm:$0xff] }
  0x52   : > { %v2352_v47 = vld [vmem:[#allocation5 + $0x120] sm:$0xff]  ;;  %v462_v57 = vld [vmem:[%s2989_s15 + $0x3c8] sm:$0xff]  ;;  %v2350_v58 = vld [vmem:[#allocation5 + $0x110] sm:$0xff] }
  0x53   : > { %2387 = vmatpush.bf16.msra.mxu3 %v2317_v18  ;;  %1055 = vmatpush.bf16.msra.mxu0 %v2317_v18  ;;  %v422_v18 = vld [vmem:[%s2989_s15 + $0x288] sm:$0xff] }
  0x54   : > { %2403 = vmatpush.bf16.msra.mxu2 %v3038_v19 }
  0x55   : > { %2395 = vmatpush.bf16.msra.mxu1 %v2325_v20 }
  0x57   : > { %2388 = vmatpush.bf16.msra.mxu3 %v2316_v21  ;;  %1056 = vmatpush.bf16.msra.mxu0 %v2316_v21 }
  0x58   : > { %2404 = vmatpush.bf16.msra.mxu2 %v3044_v24 }
  0x59   : > { %2396 = vmatpush.bf16.msra.mxu1 %v2324_v30 }
  0x5a   : > { %1067 = vmatmul.bf16.vlgmr.msra.gmra.mxu3 %v485_v33  ;;  %1057 = vmatmul.bf16.vlgmr.msra.gmra.mxu0 %v469_v35  ;;  %v439_v33 = vld [vmem:[%s2989_s15 + $0x310] sm:$0xff] }
  0x5b   : > { %1196 = vmatpush.bf16.msrb.mxu3 %v2347_v27  ;;  %1098 = vmatpush.bf16.msrb.mxu0 %v3005_v2  ;;  %v502_v2 = vpack.c.bf16 %v414_v61, %v406_v60  ;;  %v2340_v27 = vld [vmem:[#allocation5 + $0xc0] sm:$0xff]  ;;  %v343_v35 = vld [vmem:[%s2989_s15 + $0x10] sm:$0xff]  ;;  %v479_v61 = vpack.c.bf16 %v367_v55, %v359_v54 }
  0x5c   : > { %1165 = vmatmul.bf16.vlgmr.msra.gmra.mxu2 %v487_v34  ;;  %1116 = vmatmul.bf16.vlgmr.msra.gmra.mxu1 %v486_v36  ;;  %v438_v34 = vld [vmem:[%s2989_s15 + $0x308] sm:$0xff]  ;;  %v351_v36 = vld [vmem:[%s2989_s15 + $0x50] sm:$0xff]  ;;  %v393_v54 = vld [vmem:[%s2989_s15 + $0x1a0] sm:$0xff] }
  0x5d   : > { %1343 = vmatpush.bf16.msrb.mxu2 %v2371_v3  ;;  %1294 = vmatpush.bf16.msrb.mxu1 %v2363_v6  ;;  %v471_v41 = vpack.c.bf16 %v351_v36, %v343_v35  ;;  %v344_v3 = vld [vmem:[%s2989_s15 + $0x18] sm:$0xff]  ;;  %v347_v6 = vld [vmem:[%s2989_s15 + $0x30] sm:$0xff]  ;;  %v385_v35 = vld [vmem:[%s2989_s15 + $0x160] sm:$0xff] }
  0x5e   : > { %v378_v36 = vld [vmem:[%s2989_s15 + $0x128] sm:$0xff]  ;;  %v401_v55 = vld [vmem:[%s2989_s15 + $0x1e0] sm:$0xff] }
  0x5f   : > { %1197 = vmatpush.bf16.msrb.mxu3 %v2346_v37  ;;  %1099 = vmatpush.bf16.msrb.mxu0 %v3011_v5  ;;  %v2341_v5 = vld [vmem:[#allocation5 + $0xc8] sm:$0xff] }
  0x60   : > { %v446_v37 = vld [vmem:[%s2989_s15 + $0x348] sm:$0xff] }
  0x61   : > { %v518_v43 = vpack.c.bf16 %v446_v37, %v438_v34  ;;  %v377_v34 = vld [vmem:[%s2989_s15 + $0x120] sm:$0xff]  ;;  %v386_v37 = vld [vmem:[%s2989_s15 + $0x168] sm:$0xff] }
  0x63   : > { %1198 = vmatpush.bf16.msrb.mxu3 %v2345_v38  ;;  %1100 = vmatpush.bf16.msrb.mxu0 %v3017_v8  ;;  %v2362_v8 = vld [vmem:[#allocation5 + $0x170] sm:$0xff] }
  0x64   : > { %1295 = vmatpush.bf16.msrb.mxu1 %v2362_v8  ;;  %v2354_v38 = vld [vmem:[#allocation5 + $0x130] sm:$0xff]  ;;  %v345_v8 = vld [vmem:[%s2989_s15 + $0x20] sm:$0xff] }
  0x67   : > { %1199 = vmatpush.bf16.msrb.mxu3 %v2344_v39  ;;  %1101 = vmatpush.bf16.msrb.mxu0 %v3023_v11  ;;  %v421_v11 = vld [vmem:[%s2989_s15 + $0x280] sm:$0xff]  ;;  %v2358_v39 = vld [vmem:[#allocation5 + $0x150] sm:$0xff] }
  0x68   : > { %v509_v21 = vpack.c.bf16 %v429_v12, %v421_v11  ;;  %v346_v11 = vld [vmem:[%s2989_s15 + $0x28] sm:$0xff] }
  0x69   : > { %v354_v12 = vld [vmem:[%s2989_s15 + $0x68] sm:$0xff] }
  0x6a   : > { %1072 = vmatmul.bf16.gmra.mxu3 %v493_v48  ;;  %1062 = vmatmul.bf16.gmra.mxu0 %v477_v50  ;;  %v2356_v48 = vld [vmem:[#allocation5 + $0x140] sm:$0xff] }
  0x6b   : > { %1102 = vmatpush.bf16.msrb.mxu0 %v3029_v14  ;;  %1200 = vmatpush.bf16.msrb.mxu3 %v2343_v52  ;;  %v423_v14 = vld [vmem:[%s2989_s15 + $0x290] sm:$0xff]  ;;  %v453_v50 = vld [vmem:[%s2989_s15 + $0x380] sm:$0xff] }
  0x6c   : > { %1170 = vmatmul.bf16.gmra.mxu2 %v495_v49  ;;  %1121 = vmatmul.bf16.gmra.mxu1 %v494_v51  ;;  %v511_v22 = vpack.c.bf16 %v431_v15, %v423_v14  ;;  %v2351_v49 = vld [vmem:[#allocation5 + $0x118] sm:$0xff]  ;;  %v461_v51 = vld [vmem:[%s2989_s15 + $0x3c0] sm:$0xff]  ;;  %v455_v52 = vld [vmem:[%s2989_s15 + $0x390] sm:$0xff] }
  0x6d   : > { %v525_v59 = vpack.c.bf16 %v461_v51, %v453_v50  ;;  %v392_v50 = vld [vmem:[%s2989_s15 + $0x198] sm:$0xff] }
  0x6e   : > { %v400_v51 = vld [vmem:[%s2989_s15 + $0x1d8] sm:$0xff] }
  0x6f   : > { %1103 = vmatpush.bf16.msrb.mxu0 %v3035_v17  ;;  %1201 = vmatpush.bf16.msrb.mxu3 %v2342_v53  ;;  %v366_v17 = vld [vmem:[%s2989_s15 + $0xc8] sm:$0xff]  ;;  %v463_v53 = vld [vmem:[%s2989_s15 + $0x3d0] sm:$0xff] }
  0x70   : > { %v527_v60 = vpack.c.bf16 %v463_v53, %v455_v52  ;;  %v395_v52 = vld [vmem:[%s2989_s15 + $0x1b0] sm:$0xff] }
  0x71   : > { %v403_v53 = vld [vmem:[%s2989_s15 + $0x1f0] sm:$0xff] }
  0x73   : > { %1104 = vmatpush.bf16.msrb.mxu0 %v2325_v20  ;;  %1202 = vmatpush.bf16.msrb.mxu3 %v2341_v5  ;;  %v430_v20 = vld [vmem:[%s2989_s15 + $0x2c8] sm:$0xff]  ;;  %v352_v5 = vld [vmem:[%s2989_s15 + $0x58] sm:$0xff] }
  0x74   : > { %v510_v25 = vpack.c.bf16 %v430_v20, %v422_v18  ;;  %v472_v14 = vpack.c.bf16 %v352_v5, %v344_v3  ;;  %v2377_v18 = vld [vmem:[#allocation5 + $0x1e8] sm:$0xff]  ;;  %v360_v20 = vld [vmem:[%s2989_s15 + $0x98] sm:$0xff]  ;;  %v2374_v5 = vld [vmem:[#allocation5 + $0x1d0] sm:$0xff] }
  0x77   : > { %1105 = vmatpush.bf16.msrb.mxu0 %v2324_v30  ;;  %1203 = vmatpush.bf16.msrb.mxu3 %v2340_v27  ;;  %v437_v30 = vld [vmem:[%s2989_s15 + $0x300] sm:$0xff]  ;;  %v370_v27 = vld [vmem:[%s2989_s15 + $0xe8] sm:$0xff] }
  0x7a   : > { %1077 = vmatmul.bf16.gmra.mxu3 %v501_v62  ;;  %1106 = vmatmul.bf16.vlgmr.msrb.gmra.mxu0 %v470_v0  ;;  %v526_v62 = vpack.c.bf16 %v462_v57, %v454_v56  ;;  %v2378_v0 = vld [vmem:[#allocation5 + $0x1f0] sm:$0xff] }
  0x7b   : > { %1147 = vmatpush.bf16.msra.mxu0 %v3003_v1  ;;  %v2370_v1 = vld [vmem:[#allocation5 + $0x1b0] sm:$0xff] }
  0x7c   : > { %1175 = vmatmul.bf16.gmra.mxu2 %v503_v63  ;;  %1126 = vmatmul.bf16.gmra.mxu1 %v502_v2  ;;  %v2349_v63 = vld [vmem:[#allocation5 + $0x108] sm:$0xff]  ;;  %v2348_v2 = vld [vmem:[#allocation5 + $0x100] sm:$0xff] }
  0x7d   : > { %1344 = vmatpush.bf16.msrb.mxu2 %v2370_v1  ;;  %v355_v1 = vld [vmem:[%s2989_s15 + $0x70] sm:$0xff] }
  0x7e   : > { %v475_v15 = vpack.c.bf16 %v355_v1, %v347_v6 }
  0x7f   : > { %1148 = vmatpush.bf16.msra.mxu0 %v3008_v4  ;;  %v358_v4 = vld [vmem:[%s2989_s15 + $0x88] sm:$0xff] }
  0x80   : > { %v478_v23 = vpack.c.bf16 %v366_v17, %v358_v4  ;;  %v474_v17 = vpack.c.bf16 %v354_v12, %v346_v11 }
  0x81   : > { %1345 = vmatpush.bf16.msrb.mxu2 %v2369_v9  ;;  %v353_v9 = vld [vmem:[%s2989_s15 + $0x60] sm:$0xff] }
  0x82   : > { %v473_v4 = vpack.c.bf16 %v353_v9, %v345_v8 }
  0x83   : > { %1149 = vmatpush.bf16.msra.mxu0 %v3014_v7  ;;  %v2361_v7 = vld [vmem:[#allocation5 + $0x168] sm:$0xff] }
  0x84   : > { %1296 = vmatpush.bf16.msrb.mxu1 %v2361_v7  ;;  %v369_v7 = vld [vmem:[%s2989_s15 + $0xe0] sm:$0xff] }
  0x85   : > { %1346 = vmatpush.bf16.msrb.mxu2 %v2368_v26  ;;  %v362_v26 = vld [vmem:[%s2989_s15 + $0xa8] sm:$0xff] }
  0x87   : > { %1150 = vmatpush.bf16.msra.mxu0 %v3020_v10  ;;  %v2360_v10 = vld [vmem:[#allocation5 + $0x160] sm:$0xff] }
  0x88   : > { %1297 = vmatpush.bf16.msrb.mxu1 %v2360_v10 }
  0x8a   : > { %1082 = vmatmul.bf16.gmra.mxu3 %v509_v21  ;;  %1111 = vmatmul.bf16.gmra.mxu0 %v478_v23  ;;  %v368_v21 = vld [vmem:[%s2989_s15 + $0xd8] sm:$0xff]  ;;  %v371_v23 = vld [vmem:[%s2989_s15 + $0xf0] sm:$0xff] }
  0x8b   : > { %1151 = vmatpush.bf16.msra.mxu0 %v3026_v13  ;;  %v2367_v13 = vld [vmem:[#allocation5 + $0x198] sm:$0xff]  ;;  %v480_v10 = vpack.c.bf16 %v368_v21, %v360_v20  ;;  %v409_v20 = vld [vmem:[%s2989_s15 + $0x220] sm:$0xff] }
  0x8c   : > { %1180 = vmatmul.bf16.gmra.mxu2 %v511_v22  ;;  %1131 = vmatmul.bf16.gmra.mxu1 %v510_v25  ;;  %v363_v22 = vld [vmem:[%s2989_s15 + $0xb0] sm:$0xff]  ;;  %v361_v25 = vld [vmem:[%s2989_s15 + $0xa0] sm:$0xff] }
  0x8d   : > { %1347 = vmatpush.bf16.msrb.mxu2 %v2367_v13  ;;  %1298 = vmatpush.bf16.msrb.mxu1 %v2359_v29  ;;  %v483_v13 = vpack.c.bf16 %v371_v23, %v363_v22  ;;  %v482_v29 = vpack.c.bf16 %v370_v27, %v362_v26  ;;  %v417_v21 = vld [vmem:[%s2989_s15 + $0x260] sm:$0xff] }
  0x8f   : > { %1152 = vmatpush.bf16.msra.mxu0 %v3032_v16  ;;  %v447_v16 = vld [vmem:[%s2989_s15 + $0x350] sm:$0xff] }
  0x90   : > { %v519_v40 = vpack.c.bf16 %v447_v16, %v439_v33  ;;  %v379_v33 = vld [vmem:[%s2989_s15 + $0x130] sm:$0xff] }
  0x91   : > { %1348 = vmatpush.bf16.msrb.mxu2 %v2366_v31  ;;  %1299 = vmatpush.bf16.msrb.mxu1 %v2358_v39  ;;  %v376_v31 = vld [vmem:[%s2989_s15 + $0x118] sm:$0xff]  ;;  %v387_v16 = vld [vmem:[%s2989_s15 + $0x170] sm:$0xff] }
  0x92   : > { %v491_v39 = vpack.c.bf16 %v387_v16, %v379_v33  ;;  %v2373_v33 = vld [vmem:[#allocation5 + $0x1c8] sm:$0xff] }
  0x93   : > { %1153 = vmatpush.bf16.msra.mxu0 %v3038_v19  ;;  %v517_v19 = vpack.c.bf16 %v445_v32, %v437_v30  ;;  %v2376_v30 = vld [vmem:[#allocation5 + $0x1e0] sm:$0xff]  ;;  %v384_v32 = vld [vmem:[%s2989_s15 + $0x158] sm:$0xff] }
  0x95   : > { %1349 = vmatpush.bf16.msrb.mxu2 %v2365_v42  ;;  %1300 = vmatpush.bf16.msrb.mxu1 %v2357_v45  ;;  %v3134_v42 = vld [vmem:[%s3448_s2] ss:$0 sm:$0xff] }
  0x97   : > { %1154 = vmatpush.bf16.msra.mxu0 %v3044_v24  ;;  %v2379_v24 = vld [vmem:[#allocation5 + $0x1f8] sm:$0xff] }
  0x98   : > { %1392 = vmatpush.bf16.msra.mxu3 %v2379_v24 }
  0x99   : > { %1350 = vmatpush.bf16.msrb.mxu2 %v2364_v46  ;;  %1301 = vmatpush.bf16.msrb.mxu1 %v2356_v48 }
  0x9a   : > { %1087 = vmatmul.bf16.gmra.mxu3 %v517_v19  ;;  %1155 = vmatmul.bf16.vlgmr.msra.gmra.mxu0 %v471_v41  ;;  %v489_v19 = vpack.c.bf16 %v385_v35, %v377_v34  ;;  %v424_v35 = vld [vmem:[%s2989_s15 + $0x298] sm:$0xff] }
  0x9b   : > { %1245 = vmatpush.bf16.msrb.mxu0 %v2355_v28  ;;  %v481_v28 = vpack.c.bf16 %v369_v7, %v361_v25  ;;  %v410_v25 = vld [vmem:[%s2989_s15 + $0x228] sm:$0xff] }
  0x9c   : > { %1185 = vmatmul.bf16.gmra.mxu2 %v519_v40  ;;  %1136 = vmatmul.bf16.gmra.mxu1 %v518_v43  ;;  %v490_v40 = vpack.c.bf16 %v386_v37, %v378_v36  ;;  %v2375_v43 = vld [vmem:[#allocation5 + $0x1d8] sm:$0xff]  ;;  %v418_v7 = vld [vmem:[%s2989_s15 + $0x268] sm:$0xff]  ;;  %v427_v37 = vld [vmem:[%s2989_s15 + $0x2b0] sm:$0xff] }
  0x9d   : > { %1393 = vmatpush.bf16.msra.mxu3 %v2378_v0  ;;  %v432_v36 = vld [vmem:[%s2989_s15 + $0x2d8] sm:$0xff] }
  0x9f   : > { %1246 = vmatpush.bf16.msrb.mxu0 %v2354_v38  ;;  %v488_v38 = vpack.c.bf16 %v384_v32, %v376_v31  ;;  %v506_v31 = vpack.c.bf16 %v418_v7, %v410_v25 }
  0xa1   : > { %1394 = vmatpush.bf16.msra.mxu3 %v2377_v18  ;;  %v419_v18 = vld [vmem:[%s2989_s15 + $0x270] sm:$0xff] }
  0xa3   : > { %1247 = vmatpush.bf16.msrb.mxu0 %v2353_v44 }
  0xa5   : > { %1395 = vmatpush.bf16.msra.mxu3 %v2376_v30 }
  0xa7   : > { %1248 = vmatpush.bf16.msrb.mxu0 %v2352_v47 }
  0xa9   : > { %1396 = vmatpush.bf16.msra.mxu3 %v2375_v43  ;;  %v434_v43 = vld [vmem:[%s2989_s15 + $0x2e8] sm:$0xff] }
  0xaa   : > { %1092 = vmatmul.bf16.gmra.mxu3 %v525_v59  ;;  %1160 = vmatmul.bf16.gmra.mxu0 %v479_v61  ;;  %v402_v59 = vld [vmem:[%s2989_s15 + $0x1e8] sm:$0xff]  ;;  %v496_v61 = vpack.c.bf16 %v400_v51, %v392_v50 }
  0xab   : > { %1249 = vmatpush.bf16.msrb.mxu0 %v2351_v49 }
  0xac   : > { %1190 = vmatmul.bf16.gmra.mxu2 %v527_v60  ;;  %1141 = vmatmul.bf16.gmra.mxu1 %v526_v62  ;;  %v499_v62 = vpack.c.bf16 %v403_v53, %v395_v52  ;;  %v440_v52 = vld [vmem:[%s2989_s15 + $0x318] sm:$0xff] }
  0xad   : > { %1397 = vmatpush.bf16.msra.mxu3 %v2374_v5  ;;  %v448_v53 = vld [vmem:[%s2989_s15 + $0x358] sm:$0xff] }
  0xaf   : > { %1250 = vmatpush.bf16.msrb.mxu0 %v2350_v58  ;;  %v394_v58 = vld [vmem:[%s2989_s15 + $0x1a8] sm:$0xff] }
  0xb1   : > { %1398 = vmatpush.bf16.msra.mxu3 %v2373_v33 }
  0xb3   : > { %1251 = vmatpush.bf16.msrb.mxu0 %v2349_v63  ;;  %v497_v63 = vpack.c.bf16 %v401_v55, %v393_v54  ;;  %v443_v54 = vld [vmem:[%s2989_s15 + $0x330] sm:$0xff] }
  0xb4   : > { %v451_v55 = vld [vmem:[%s2989_s15 + $0x370] sm:$0xff] }
  0xb7   : > { %1252 = vmatpush.bf16.msrb.mxu0 %v2348_v2  ;;  %v498_v2 = vpack.c.bf16 %v402_v59, %v394_v58 }
  0xba   : > { %1204 = vmatmul.bf16.vlgmr.msrb.gmra.mxu3 %v472_v14  ;;  %1253 = vmatmul.bf16.vlgmr.msrb.gmra.mxu0 %v473_v4  ;;  %v416_v4 = vld [vmem:[%s2989_s15 + $0x258] sm:$0xff] }
  0xbc   : > { %1351 = vmatmul.bf16.vlgmr.msrb.gmra.mxu2 %v475_v15  ;;  %1302 = vmatmul.bf16.vlgmr.msrb.gmra.mxu1 %v474_v17  ;;  %v408_v15 = vld [vmem:[%s2989_s15 + $0x218] sm:$0xff]  ;;  %v411_v17 = vld [vmem:[%s2989_s15 + $0x230] sm:$0xff] }
  0xbd   : > { %v504_v27 = vpack.c.bf16 %v416_v4, %v408_v15  ;;  %v457_v15 = vld [vmem:[%s2989_s15 + $0x3a0] sm:$0xff] }
  0xbe   : > { %v465_v4 = vld [vmem:[%s2989_s15 + $0x3e0] sm:$0xff] }
  0xca   : > { %1209 = vmatmul.bf16.gmra.mxu3 %v480_v10  ;;  %1258 = vmatmul.bf16.gmra.mxu0 %v481_v28  ;;  %v507_v10 = vpack.c.bf16 %v419_v18, %v411_v17  ;;  %v458_v18 = vld [vmem:[%s2989_s15 + $0x3a8] sm:$0xff] }
  0xcc   : > { %1356 = vmatmul.bf16.gmra.mxu2 %v483_v13  ;;  %1307 = vmatmul.bf16.gmra.mxu1 %v482_v29  ;;  %v505_v29 = vpack.c.bf16 %v417_v21, %v409_v20  ;;  %v466_v20 = vld [vmem:[%s2989_s15 + $0x3e8] sm:$0xff] }
  0xcd   : > { %v530_v25 = vpack.c.bf16 %v466_v20, %v458_v18  ;;  %v1596_v20 = vld [vmem:[#allocation7 + $0x58] sm:$0xff] }
  0xd7   : > { %v3137_v48 = vpop.f32.mrf.mxu0 }
  0xd9   : > { %v1117_v41 = vpop.f32.mrf.mxu1 }
  0xda   : > { %1214 = vmatmul.bf16.gmra.mxu3 %v488_v38  ;;  %1263 = vmatmul.bf16.gmra.mxu0 %v489_v19  ;;  %v435_v38 = vld [vmem:[%s2989_s15 + $0x2f0] sm:$0xff]  ;;  %v433_v19 = vld [vmem:[%s2989_s15 + $0x2e0] sm:$0xff] }
  0xdc   : > { %1361 = vmatmul.bf16.gmra.mxu2 %v491_v39  ;;  %1312 = vmatmul.bf16.gmra.mxu1 %v490_v40  ;;  %v425_v39 = vld [vmem:[%s2989_s15 + $0x2a0] sm:$0xff] }
  0xdd   : > { %v1068_v44 = vpop.f32.mrf.mxu3 }
  0xde   : > { %v1069_v45 = vadd.f32 %v3134_v42, %v1068_v44  ;;  %v512_v44 = vpack.c.bf16 %v432_v36, %v424_v35 }
  0xdf   : > { %v1166_v24 = vpop.f32.mrf.mxu2  ;;  %v3152_v1 = vpop.f32.mrf.mxu0 }
  0xe0   : > { %v1118_v46 = vadd.f32 %v1117_v41, %v1069_v45  ;;  %v426_v41 = vld [vmem:[%s2989_s15 + $0x2a8] sm:$0xff]  ;;  %v513_v45 = vpack.c.bf16 %v433_v19, %v425_v39  ;;  %v1061_v35 = vadd.f32 %v3134_v42, %v3152_v1  ;;  %v372_v1 = vld [vmem:[%s2989_s15 + $0xf8] sm:$0xff] }
  0xe1   : > { %v1119_v47 = vpop.f32.mrf.mxu1 }
  0xe2   : > { %v3139_v49 = vadd.f32 %v1166_v24, %v1118_v46  ;;  %v515_v24 = vpack.c.bf16 %v435_v38, %v427_v37  ;;  %v514_v46 = vpack.c.bf16 %v434_v43, %v426_v41  ;;  %v1600_v37 = vld [vmem:[#allocation7 + $0x78] sm:$0xff] }
  0xe3   : > { %v1681_v38 = vld [vmem:[#allocation8 + $0x78] sm:$0xff]  ;;  %1601 = vmatpush.msra.mxu0 %v1600_v37  ;;  %v1594_v37 = vld [vmem:[#allocation7 + $0x48] sm:$0xff] }
  0xe4   : > { %1682 = vmatpush.msra.mxu1 %v1681_v38 }
  0xe5   : > { %v1070_v56 = vpop.f32.mrf.mxu3 }
  0xe6   : > { %v1071_v60 = vadd.f32 %v3134_v42, %v1070_v56  ;;  %v441_v56 = vld [vmem:[%s2989_s15 + $0x320] sm:$0xff] }
  0xe7   : > { %v1168_v57 = vpop.f32.mrf.mxu2  ;;  %v3166_v13 = vpop.f32.mrf.mxu0 }
  0xe8   : > { %v1120_v0 = vadd.f32 %v1119_v47, %v1071_v60  ;;  %v2372_v47 = vld [vmem:[#allocation5 + $0x1c0] sm:$0xff]  ;;  %v442_v60 = vld [vmem:[%s2989_s15 + $0x328] sm:$0xff]  ;;  %v1064_v43 = vadd.f32 %v3134_v42, %v3166_v13 }
  0xe9   : > { %v1122_v6 = vpop.f32.mrf.mxu1  ;;  %1399 = vmatpush.bf16.msra.mxu3 %v2372_v47 }
  0xea   : > { %v3150_v3 = vadd.f32 %v1168_v57, %v1120_v0  ;;  %1219 = vmatmul.bf16.gmra.mxu3 %v496_v61  ;;  %1268 = vmatmul.bf16.gmra.mxu0 %v497_v63  ;;  %v449_v57 = vld [vmem:[%s2989_s15 + $0x360] sm:$0xff]  ;;  %v450_v61 = vld [vmem:[%s2989_s15 + $0x368] sm:$0xff]  ;;  %v523_v63 = vpack.c.bf16 %v451_v55, %v443_v54 }
  0xeb   : > { %v521_v0 = vpack.c.bf16 %v449_v57, %v441_v56  ;;  %v1598_v57 = vld [vmem:[#allocation7 + $0x68] sm:$0xff] }
  0xec   : > { %1366 = vmatmul.bf16.gmra.mxu2 %v499_v62  ;;  %1317 = vmatmul.bf16.gmra.mxu1 %v498_v2  ;;  %v520_v62 = vpack.c.bf16 %v448_v53, %v440_v52  ;;  %v522_v2 = vpack.c.bf16 %v450_v61, %v442_v60 }
  0xed   : > { %v1073_v8 = vpop.f32.mrf.mxu3 }
  0xee   : > { %v1074_v11 = vadd.f32 %v3134_v42, %v1073_v8  ;;  %v456_v8 = vld [vmem:[%s2989_s15 + $0x398] sm:$0xff] }
  0xef   : > { %v1171_v9 = vpop.f32.mrf.mxu2  ;;  %v3172_v34 = vpop.f32.mrf.mxu0 }
  0xf0   : > { %v1123_v12 = vadd.f32 %v1122_v6, %v1074_v11  ;;  %v459_v11 = vld [vmem:[%s2989_s15 + $0x3b0] sm:$0xff]  ;;  %v1066_v56 = vadd.f32 %v3134_v42, %v3172_v34  ;;  %v380_v34 = vld [vmem:[%s2989_s15 + $0x138] sm:$0xff] }
  0xf1   : > { %v1124_v23 = vpop.f32.mrf.mxu1 }
  0xf2   : > { %v3155_v14 = vadd.f32 %v1171_v9, %v1123_v12  ;;  %v464_v9 = vld [vmem:[%s2989_s15 + $0x3d8] sm:$0xff]  ;;  %v467_v12 = vld [vmem:[%s2989_s15 + $0x3f0] sm:$0xff] }
  0xf3   : > { %v528_v21 = vpack.c.bf16 %v464_v9, %v456_v8  ;;  %v1678_v8 = vld [vmem:[#allocation8 + $0x60] sm:$0xff] }
  0xf5   : > { %v1075_v22 = vpop.f32.mrf.mxu3 }
  0xf6   : > { %v1076_v26 = vadd.f32 %v3134_v42, %v1075_v22  ;;  %v531_v22 = vpack.c.bf16 %v467_v12, %v459_v11  ;;  %v388_v11 = vld [vmem:[%s2989_s15 + $0x178] sm:$0xff] }
  0xf7   : > { %v1173_v28 = vpop.f32.mrf.mxu2  ;;  %v1107_v50 = vpop.f32.mrf.mxu0 }
  0xf8   : > { %v1125_v30 = vadd.f32 %v1124_v23, %v1076_v26  ;;  %v529_v23 = vpack.c.bf16 %v465_v4, %v457_v15  ;;  %v492_v4 = vpack.c.bf16 %v388_v11, %v380_v34 }
  0xf9   : > { %v3226_v55 = vpop.f32.mrf.mxu1 }
  0xfa   : > { %v3168_v32 = vadd.f32 %v1173_v28, %v1125_v30  ;;  %1224 = vmatmul.bf16.gmra.mxu3 %v504_v27  ;;  %1273 = vmatmul.bf16.gmra.mxu0 %v505_v29  ;;  %v1059_v27 = vadd.f32 %v3134_v42, %v3137_v48  ;;  %v348_v28 = vld [vmem:[%s2989_s15 + $0x38] sm:$0xff] }
  0xfb   : > { %v356_v29 = vld [vmem:[%s2989_s15 + $0x78] sm:$0xff] }
  0xfc   : > { %1371 = vmatmul.bf16.gmra.mxu2 %v507_v10  ;;  %1322 = vmatmul.bf16.gmra.mxu1 %v506_v31  ;;  %v1108_v31 = vadd.f32 %v1107_v50, %v1059_v27  ;;  %v476_v33 = vpack.c.bf16 %v356_v29, %v348_v28  ;;  %v1595_v27 = vld [vmem:[#allocation7 + $0x50] sm:$0xff]  ;;  %v396_v28 = vld [vmem:[%s2989_s15 + $0x1b8] sm:$0xff] }
  0xfd   : > { %v3170_v16 = vpop.f32.mrf.mxu3  ;;  %v404_v29 = vld [vmem:[%s2989_s15 + $0x1f8] sm:$0xff] }
  0xff   : > { %v1109_v58 = vpop.f32.mrf.mxu0  ;;  %v3230_v60 = vpop.f32.mrf.mxu2 }
 0x100   : > { %v1110_v19 = vadd.f32 %v1109_v58, %v1061_v35  ;;  %v1679_v58 = vld [vmem:[#allocation8 + $0x68] sm:$0xff]  ;;  %v500_v35 = vpack.c.bf16 %v404_v29, %v396_v28  ;;  %v1589_v28 = vld [vmem:[#allocation7 + $0x20] sm:$0xff] }
 0x101   : > { %v1129_v9 = vpop.f32.mrf.mxu1 }
 0x105   : > { %v3180_v40 = vpop.f32.mrf.mxu3 }
 0x107   : > { %v1112_v6 = vpop.f32.mrf.mxu0  ;;  %v1178_v18 = vpop.f32.mrf.mxu2 }
 0x108   : > { %v1113_v50 = vadd.f32 %v1112_v6, %v1064_v43  ;;  %v1597_v6 = vld [vmem:[#allocation7 + $0x60] sm:$0xff] }
 0x109   : > { %v1593_v43 = vld [vmem:[#allocation7 + $0x40] sm:$0xff] }
 0x10a   : > { %1229 = vmatmul.bf16.gmra.mxu3 %v512_v44  ;;  %1278 = vmatmul.bf16.gmra.mxu0 %v513_v45  ;;  %v1680_v45 = vld [vmem:[#allocation8 + $0x70] sm:$0xff] }
 0x10b   : > { %1683 = vmatpush.msra.mxu1 %v1680_v45  ;;  %v1079_v45 = vadd.f32 %v3134_v42, %v3170_v16 }
 0x10c   : > { %1376 = vmatmul.bf16.gmra.mxu2 %v515_v24  ;;  %1327 = vmatmul.bf16.gmra.mxu1 %v514_v46  ;;  %v1599_v24 = vld [vmem:[#allocation7 + $0x70] sm:$0xff]  ;;  %v364_v46 = vld [vmem:[%s2989_s15 + $0xb8] sm:$0xff] }
 0x10d   : > { %v3184_v51 = vpop.f32.mrf.mxu3  ;;  %1602 = vmatpush.msra.mxu0 %v1599_v24  ;;  %v484_v53 = vpack.c.bf16 %v372_v1, %v364_v46  ;;  %1684 = vmatpush.msra.mxu1 %v1679_v58  ;;  %v412_v24 = vld [vmem:[%s2989_s15 + $0x238] sm:$0xff] }
 0x10f   : > { %v1114_v7 = vpop.f32.mrf.mxu0  ;;  %1603 = vmatpush.msra.mxu0 %v1598_v57  ;;  %1685 = vmatpush.msra.mxu1 %v1678_v8  ;;  %v1084_v8 = vadd.f32 %v3134_v42, %v3184_v51 }
 0x111   : > { %1604 = vmatpush.msra.mxu0 %v1597_v6 }
 0x113   : > { %1605 = vmatpush.msra.mxu0 %v1596_v20  ;;  %v1671_v20 = vld [vmem:[#allocation8 + $0x28] sm:$0xff] }
 0x115   : > { %v3192_v59 = vpop.f32.mrf.mxu3  ;;  %1606 = vmatpush.msra.mxu0 %v1595_v27 }
 0x117   : > { %v1156_v10 = vpop.f32.mrf.mxu0  ;;  %1607 = vmatpush.msra.mxu0 %v1594_v37  ;;  %v452_v37 = vld [vmem:[%s2989_s15 + $0x378] sm:$0xff] }
 0x118   : > { %v1157_v36 = vadd.f32 %v1156_v10, %v1108_v31  ;;  %v1676_v10 = vld [vmem:[#allocation8 + $0x50] sm:$0xff] }
 0x119   : > { %1608 = vmatpush.msra.mxu0 %v1593_v43 }
 0x11a   : > { %1234 = vmatmul.bf16.gmra.mxu3 %v520_v62  ;;  %1283 = vmatmul.bf16.gmra.mxu0 %v521_v0  ;;  %v1115_v62 = vadd.f32 %v1114_v7, %v1066_v56  ;;  %v3241_v7 = vpop.f32.mrf.mxu2 }
 0x11c   : > { %1381 = vmatmul.bf16.gmra.mxu2 %v523_v63  ;;  %1332 = vmatmul.bf16.gmra.mxu1 %v522_v2 }
 0x11d   : > { %v3196_v5 = vpop.f32.mrf.mxu3 }
 0x11f   : > { %v1158_v39 = vpop.f32.mrf.mxu0 }
 0x120   : > { %v1159_v44 = vadd.f32 %v1158_v39, %v1110_v19 }
 0x122   : > { %v3248_v38 = vpop.f32.mrf.mxu2 }
 0x125   : > { %v3204_v17 = vpop.f32.mrf.mxu3 }
 0x127   : > { %v1161_v54 = vpop.f32.mrf.mxu0 }
 0x128   : > { %v1162_v13 = vadd.f32 %v1161_v54, %v1113_v50  ;;  %v1673_v54 = vld [vmem:[#allocation8 + $0x38] sm:$0xff] }
 0x12a   : > { %1239 = vmatmul.bf16.gmra.mxu3 %v528_v21  ;;  %1288 = vmatmul.bf16.gmra.mxu0 %v529_v23  ;;  %v1677_v21 = vld [vmem:[#allocation8 + $0x58] sm:$0xff]  ;;  %v3259_v46 = vpop.f32.mrf.mxu2 }
 0x12b   : > { %1686 = vmatpush.msra.mxu1 %v1677_v21 }
 0x12c   : > { %1386 = vmatmul.bf16.gmra.mxu2 %v531_v22  ;;  %1337 = vmatmul.bf16.gmra.mxu1 %v530_v25  ;;  %v1132_v22 = vpop.f32.mrf.mxu1 }
 0x12d   : > { %v3208_v26 = vpop.f32.mrf.mxu3  ;;  %1687 = vmatpush.msra.mxu1 %v1676_v10 }
 0x12f   : > { %v1163_v0 = vpop.f32.mrf.mxu0 }
 0x130   : > { %v1164_v2 = vadd.f32 %v1163_v0, %v1115_v62  ;;  %v1672_v62 = vld [vmem:[#allocation8 + $0x30] sm:$0xff]  ;;  %v428_v0 = vld [vmem:[%s2989_s15 + $0x2b8] sm:$0xff] }
 0x132   : > { %v3272_v58 = vpop.f32.mrf.mxu2 }
 0x135   : > { %v3214_v30 = vpop.f32.mrf.mxu3 }
 0x13a   : > { %1400 = vmatmul.bf16.vlgmr.msra.gmra.mxu3 %v476_v33 }
 0x13d   : > { %v1205_v48 = vpop.f32.mrf.mxu3 }
 0x13e   : > { %v3218_v41 = vadd.f32 %v1205_v48, %v1157_v36  ;;  %v1134_v36 = vpop.f32.mrf.mxu1 }
 0x145   : > { %v1207_v47 = vpop.f32.mrf.mxu3 }
 0x146   : > { %v3224_v52 = vadd.f32 %v1207_v47, %v1159_v44  ;;  %v3253_v19 = vpop.f32.mrf.mxu1  ;;  %v1674_v44 = vld [vmem:[#allocation8 + $0x40] sm:$0xff] }
 0x14a   : > { %1405 = vmatmul.bf16.gmra.mxu3 %v484_v53  ;;  %v1592_v53 = vld [vmem:[#allocation7 + $0x38] sm:$0xff] }
 0x14b   : > { %1609 = vmatpush.msra.mxu0 %v1592_v53 }
 0x14d   : > { %v1210_v61 = vpop.f32.mrf.mxu3 }
 0x14e   : > { %v3232_v63 = vadd.f32 %v1210_v61, %v1162_v13  ;;  %v3265_v56 = vpop.f32.mrf.mxu1  ;;  %v1081_v13 = vadd.f32 %v3134_v42, %v3180_v40 }
 0x150   : > { %v1130_v61 = vadd.f32 %v1129_v9, %v1081_v13  ;;  %v1590_v9 = vld [vmem:[#allocation7 + $0x28] sm:$0xff] }
 0x152   : > { %v1179_v6 = vadd.f32 %v1178_v18, %v1130_v61  ;;  %v1086_v18 = vadd.f32 %v3134_v42, %v3192_v59  ;;  %v468_v61 = vld [vmem:[%s2989_s15 + $0x3f8] sm:$0xff] }
 0x154   : > { %v1135_v10 = vadd.f32 %v1134_v36, %v1086_v18 }
 0x155   : > { %v1212_v12 = vpop.f32.mrf.mxu3 }
 0x156   : > { %v3236_v15 = vadd.f32 %v1212_v12, %v1164_v2  ;;  %v436_v2 = vld [vmem:[%s2989_s15 + $0x2f8] sm:$0xff]  ;;  %v1133_v12 = vadd.f32 %v1132_v22, %v1084_v8  ;;  %v1670_v22 = vld [vmem:[#allocation8 + $0x20] sm:$0xff] }
 0x157   : > { %v516_v40 = vpack.c.bf16 %v436_v2, %v428_v0 }
 0x158   : > { %v1182_v21 = vadd.f32 %v3241_v7, %v1133_v12  ;;  %v1089_v7 = vadd.f32 %v3134_v42, %v3196_v5  ;;  %v1091_v5 = vadd.f32 %v3134_v42, %v3204_v17 }
 0x15a   : > { %1410 = vmatmul.bf16.gmra.mxu3 %v492_v4  ;;  %v1191_v4 = vpop.f32.mrf.mxu2  ;;  %v1138_v36 = vadd.f32 %v3253_v19, %v1089_v7 }
 0x15d   : > { %v1215_v23 = vpop.f32.mrf.mxu3 }
 0x15e   : > { %v3239_v25 = vadd.f32 %v1215_v23, %v3139_v49  ;;  %v1675_v49 = vld [vmem:[#allocation8 + $0x48] sm:$0xff] }
 0x15f   : > { %1688 = vmatpush.msra.mxu1 %v1675_v49  ;;  %v1184_v49 = vadd.f32 %v3248_v38, %v1135_v10  ;;  %v1187_v38 = vadd.f32 %v3259_v46, %v1138_v36  ;;  %v1094_v46 = vadd.f32 %v3134_v42, %v3208_v26 }
 0x161   : > { %1689 = vmatpush.msra.mxu1 %v1674_v44 }
 0x162   : > { %v1193_v29 = vpop.f32.mrf.mxu2 }
 0x163   : > { %1690 = vmatpush.msra.mxu1 %v1673_v54  ;;  %v1666_v54 = vld [vmem:[#allocation8] sm:$0xff] }
 0x165   : > { %v1217_v31 = vpop.f32.mrf.mxu3  ;;  %1691 = vmatpush.msra.mxu1 %v1672_v62 }
 0x166   : > { %v3246_v33 = vadd.f32 %v1217_v31, %v3150_v3  ;;  %v420_v3 = vld [vmem:[%s2989_s15 + $0x278] sm:$0xff]  ;;  %v1254_v31 = vpop.f32.mrf.mxu0 }
 0x167   : > { %v508_v50 = vpack.c.bf16 %v420_v3, %v412_v24  ;;  %1692 = vmatpush.msra.mxu1 %v1671_v20  ;;  %v1669_v24 = vld [vmem:[#allocation8 + $0x18] sm:$0xff]  ;;  %v1255_v18 = vadd.f32 %v1254_v31, %v3218_v41 }
 0x168   : > { %v1588_v3 = vld [vmem:[#allocation7 + $0x18] sm:$0xff] }
 0x169   : > { %1693 = vmatpush.msra.mxu1 %v1670_v22  ;;  %v1586_v22 = vld [vmem:[#allocation7 + $0x8] sm:$0xff] }
 0x16a   : > { %1415 = vmatmul.bf16.gmra.mxu3 %v500_v35  ;;  %v444_v35 = vld [vmem:[%s2989_s15 + $0x338] sm:$0xff] }
 0x16b   : > { %v524_v43 = vpack.c.bf16 %v452_v37, %v444_v35  ;;  %1694 = vmatpush.msra.mxu1 %v1669_v24  ;;  %v1585_v35 = vld [vmem:[#allocation7] sm:$0xff] }
 0x16d   : > { %v1220_v39 = vpop.f32.mrf.mxu3 }
 0x16e   : > { %v3251_v48 = vadd.f32 %v1220_v39, %v3155_v14  ;;  %v1128_v14 = vadd.f32 %v3226_v55, %v1079_v45  ;;  %v1591_v55 = vld [vmem:[#allocation7 + $0x30] sm:$0xff] }
 0x16f   : > { %1610 = vmatpush.msra.mxu0 %v1591_v55  ;;  %v1668_v45 = vld [vmem:[#allocation8 + $0x10] sm:$0xff] }
 0x170   : > { %v1177_v16 = vadd.f32 %v3230_v60, %v1128_v14  ;;  %v1142_v60 = vpop.f32.mrf.mxu1  ;;  %1695 = vmatpush.msra.mxu1 %v1668_v45  ;;  %v1256_v14 = vpop.f32.mrf.mxu0 }
 0x171   : > { %1611 = vmatpush.msra.mxu0 %v1590_v9  ;;  %v1143_v8 = vadd.f32 %v1142_v60, %v1094_v46 }
 0x173   : > { %1612 = vmatpush.msra.mxu0 %v1589_v28 }
 0x175   : > { %v1222_v1 = vpop.f32.mrf.mxu3  ;;  %1613 = vmatpush.msra.mxu0 %v1588_v3 }
 0x176   : > { %v3262_v47 = vadd.f32 %v1222_v1, %v3168_v32  ;;  %v1352_v1 = vpop.f32.mrf.mxu2 }
 0x178   : > { %v1144_v27 = vpop.f32.mrf.mxu1 }
 0x17a   : > { %1420 = vmatmul.bf16.gmra.mxu3 %v508_v50  ;;  %v1667_v50 = vld [vmem:[#allocation8 + $0x8] sm:$0xff] }
 0x17b   : > { %1696 = vmatpush.msra.mxu1 %v1667_v50 }
 0x17d   : > { %v1225_v57 = vpop.f32.mrf.mxu3  ;;  %1697 = vmatpush.msra.mxu1 %v1666_v54 }
 0x17e   : > { %v3270_v32 = vadd.f32 %v1225_v57, %v1177_v16  ;;  %v1140_v16 = vadd.f32 %v3265_v56, %v1091_v5  ;;  %v460_v57 = vld [vmem:[%s2989_s15 + $0x3b8] sm:$0xff]  ;;  %v1354_v62 = vpop.f32.mrf.mxu2  ;;  %v1096_v56 = vadd.f32 %v3134_v42, %v3214_v30 }
 0x17f   : > { %v532_v2 = vpack.c.bf16 %v468_v61, %v460_v57 }
 0x180   : > { %v1303_v44 = vpop.f32.mrf.mxu1  ;;  %v1189_v55 = vadd.f32 %v3272_v58, %v1140_v16  ;;  %v1145_v20 = vadd.f32 %v1144_v27, %v1096_v56  ;;  %v1257_v27 = vadd.f32 %v1256_v14, %v3224_v52 }
 0x182   : > { %v1194_v26 = vadd.f32 %v1193_v29, %v1145_v20 }
 0x185   : > { %v1227_v34 = vpop.f32.mrf.mxu3 }
 0x186   : > { %v3278_v11 = vadd.f32 %v1227_v34, %v1179_v6  ;;  %v1259_v6 = vpop.f32.mrf.mxu0  ;;  %v1357_v58 = vpop.f32.mrf.mxu2 }
 0x187   : > { %v1260_v24 = vadd.f32 %v1259_v6, %v3232_v63 }
 0x188   : > { %v1305_v13 = vpop.f32.mrf.mxu1 }
 0x189   : > { %v1306_v41 = vadd.f32 %v1305_v13, %v1257_v27 }
 0x18a   : > { %1425 = vmatmul.bf16.gmra.mxu3 %v516_v40  ;;  %v1192_v40 = vadd.f32 %v1191_v4, %v1143_v8  ;;  %v1304_v4 = vadd.f32 %v1303_v44, %v1255_v18  ;;  %v1825_v18 = vld [vmem:[#allocation10 + $0x70] sm:$0xff] }
 0x18b   : > { %v1355_v36 = vadd.f32 %v1354_v62, %v1306_v41 }
 0x18c   : > { %v1353_v37 = vadd.f32 %v1352_v1, %v1304_v4 }
 0x18d   : > { %v1230_v51 = vpop.f32.mrf.mxu3 }
 0x18e   : > { %v3283_v23 = vadd.f32 %v1230_v51, %v1182_v21  ;;  %v1261_v21 = vpop.f32.mrf.mxu0  ;;  %v1587_v51 = vld [vmem:[#allocation7 + $0x10] sm:$0xff]  ;;  %v1359_v42 = vpop.f32.mrf.mxu2 }
 0x18f   : > { %1614 = vmatpush.msra.mxu0 %v1587_v51  ;;  %v1262_v54 = vadd.f32 %v1261_v21, %v3236_v15 }
 0x190   : > { %v1308_v34 = vpop.f32.mrf.mxu1 }
 0x191   : > { %1615 = vmatpush.msra.mxu0 %v1586_v22  ;;  %v1309_v1 = vadd.f32 %v1308_v34, %v1260_v24 }
 0x193   : > { %1616 = vmatpush.msra.mxu0 %v1585_v35 }
 0x195   : > { %v1232_v39 = vpop.f32.mrf.mxu3 }
 0x196   : > { %v3290_v59 = vadd.f32 %v1232_v39, %v1184_v49  ;;  %v1264_v30 = vpop.f32.mrf.mxu0 }
 0x197   : > { %v1265_v34 = vadd.f32 %v1264_v30, %v3239_v25 }
 0x198   : > { %v1310_v10 = vpop.f32.mrf.mxu1 }
 0x199   : > { %v1311_v62 = vadd.f32 %v1310_v10, %v1262_v54 }
 0x19a   : > { %1430 = vmatmul.bf16.gmra.mxu3 %v524_v43  ;;  %v1362_v43 = vpop.f32.mrf.mxu2 }
 0x19b   : > { %v1360_v15 = vadd.f32 %v1359_v42, %v1311_v62 }
 0x19d   : > { %v1235_v53 = vpop.f32.mrf.mxu3 }
 0x19e   : > { %v3296_v19 = vadd.f32 %v1235_v53, %v1187_v38  ;;  %v1266_v44 = vpop.f32.mrf.mxu0  ;;  %v1358_v53 = vadd.f32 %v1357_v58, %v1309_v1 }
 0x19f   : > { %v1267_v30 = vadd.f32 %v1266_v44, %v3246_v33 }
 0x1a0   : > { %v1313_v7 = vpop.f32.mrf.mxu1 }
 0x1a1   : > { %v1314_v10 = vadd.f32 %v1313_v7, %v1265_v34 }
 0x1a2   : > { %v1364_v13 = vpop.f32.mrf.mxu2 }
 0x1a3   : > { %v1363_v42 = vadd.f32 %v1362_v43, %v1314_v10 }
 0x1a5   : > { %v1237_v17 = vpop.f32.mrf.mxu3 }
 0x1a6   : > { %v3304_v0 = vadd.f32 %v1237_v17, %v1189_v55  ;;  %v1826_v55 = vld [vmem:[#allocation10 + $0x78] sm:$0xff]  ;;  %v1269_v46 = vpop.f32.mrf.mxu0 }
 0x1a7   : > { %1827 = vmatpush.msra.mxu2 %v1826_v55 }
 0x1a8   : > { %v1315_v5 = vpop.f32.mrf.mxu1 }
 0x1a9   : > { %1828 = vmatpush.msra.mxu2 %v1825_v18  ;;  %v1316_v24 = vadd.f32 %v1315_v5, %v1267_v30 }
 0x1aa   : > { %1435 = vmatmul.bf16.gmra.mxu3 %v532_v2  ;;  %v1367_v51 = vpop.f32.mrf.mxu2 }
 0x1ad   : > { %v1240_v12 = vpop.f32.mrf.mxu3 }
 0x1ae   : > { %v3308_v9 = vadd.f32 %v1240_v12, %v1192_v40  ;;  %v1271_v25 = vpop.f32.mrf.mxu0 }
 0x1b0   : > { %v1318_v6 = vpop.f32.mrf.mxu1 }
 0x1b2   : > { %v1369_v43 = vpop.f32.mrf.mxu2 }
 0x1b5   : > { %v1242_v28 = vpop.f32.mrf.mxu3 }
 0x1b6   : > { %v3311_v60 = vadd.f32 %v1242_v28, %v1194_v26 }
 0x1bd   : > { %v1401_v49 = vpop.f32.mrf.mxu3 }
 0x1be   : > { %v1402_v29 = vadd.f32 %v1401_v49, %v1353_v37  ;;  %v1320_v49 = vpop.f32.mrf.mxu1 }
 0x1c0   : > { %v1457_v31 = vand.u32 2147483647, %v1402_v29  ;;  %1698 = vmatmul.f32.vlgmr.msra.gmra.mxu1 %v1402_v29  ;;  %v1441_v20 = vmax.f32 %v1402_v29, 0.0 }
 0x1c2   : > { %v1473_v39 = vsub.f32 0.0, %v1457_v31 }
 0x1c4   : > { %v1489_v3 = vmul.f32 1.442695, %v1473_v39 }
 0x1c5   : > { %v1403_v45 = vpop.f32.mrf.mxu3 }
 0x1c6   : > { %2500 = vpow2.f32 %v1489_v3  ;;  %v3315_v38 = vadd.f32 %v1403_v45, %v1355_v36  ;;  %v1824_v36 = vld [vmem:[#allocation10 + $0x68] sm:$0xff]  ;;  %v1274_v45 = vpop.f32.mrf.mxu0  ;;  %v1323_v55 = vpop.f32.mrf.mxu1 }
 0x1c7   : > { %1829 = vmatpush.msra.mxu2 %v1824_v36 }
 0x1c8   : > { %v1458_v52 = vand.u32 2147483647, %v3315_v38  ;;  %1701 = vmatmul.f32.gmra.mxu1 %v3315_v38  ;;  %v1442_v31 = vmax.f32 %v3315_v38, 0.0  ;;  %v1270_v38 = vadd.f32 %v1269_v46, %v3251_v48  ;;  %v1372_v46 = vpop.f32.mrf.mxu2 }
 0x1ca   : > { %v1474_v50 = vsub.f32 0.0, %v1458_v52  ;;  %v1365_v52 = vadd.f32 %v1364_v13, %v1316_v24  ;;  %v1319_v62 = vadd.f32 %v1318_v6, %v1270_v38 }
 0x1cc   : > { %v2501_v14 = vpop.eup %2500  ;;  %v1491_v16 = vmul.f32 1.442695, %v1474_v50 }
 0x1cd   : > { %v1521_v63 = vadd.f32 1.0, %v2501_v14  ;;  %v1406_v57 = vpop.f32.mrf.mxu3 }
 0x1ce   : > { %2502 = vpow2.f32 %v1491_v16  ;;  %v3320_v61 = vadd.f32 %v1406_v57, %v1358_v53  ;;  %v1823_v57 = vld [vmem:[#allocation10 + $0x60] sm:$0xff] }
 0x1cf   : > { %2504 = vlog2.f32 %v1521_v63  ;;  %1830 = vmatpush.msra.mxu2 %v1823_v57 }
 0x1d0   : > { %v1459_v17 = vand.u32 2147483647, %v3320_v61  ;;  %1704 = vmatmul.f32.gmra.mxu1 %v3320_v61  ;;  %v1443_v16 = vmax.f32 %v3320_v61, 0.0  ;;  %v1272_v61 = vadd.f32 %v1271_v25, %v3262_v47 }
 0x1d2   : > { %v1475_v2 = vsub.f32 0.0, %v1459_v17  ;;  %v1321_v18 = vadd.f32 %v1320_v49, %v1272_v61 }
 0x1d4   : > { %v2503_v8 = vpop.eup %2502  ;;  %v1493_v40 = vmul.f32 1.442695, %v1475_v2  ;;  %v1370_v25 = vadd.f32 %v1369_v43, %v1321_v18 }
 0x1d5   : > { %v2505_v56 = vpop.eup %2504  ;;  %v1408_v12 = vpop.f32.mrf.mxu3  ;;  %v1522_v58 = vadd.f32 1.0, %v2503_v8  ;;  %v1368_v8 = vadd.f32 %v1367_v51, %v1319_v62 }
 0x1d6   : > { %v1538_v21 = vmul.f32 0.6931472, %v2505_v56  ;;  %2506 = vpow2.f32 %v1493_v40  ;;  %v3325_v26 = vadd.f32 %v1408_v12, %v1360_v15  ;;  %v1276_v40 = vpop.f32.mrf.mxu0  ;;  %v1325_v51 = vpop.f32.mrf.mxu1 }
 0x1d7   : > { %2508 = vlog2.f32 %v1522_v58 }
 0x1d8   : > { %v1569_v28 = vadd.f32 %v1538_v21, %v1441_v20  ;;  %v1460_v22 = vand.u32 2147483647, %v3325_v26  ;;  %1707 = vmatmul.f32.gmra.mxu1 %v3325_v26  ;;  %v1444_v58 = vmax.f32 %v3325_v26, 0.0  ;;  %v1822_v21 = vld [vmem:[#allocation10 + $0x58] sm:$0xff]  ;;  %v1275_v26 = vadd.f32 %v1274_v45, %v3270_v32 }
 0x1d9   : > { %1831 = vmatpush.msra.mxu2 %v1822_v21 }
 0x1da   : > { %v1476_v4 = vsub.f32 0.0, %v1460_v22  ;;  %1617 = vmatmul.f32.vlgmr.msra.gmra.mxu0 %v1569_v28 }
 0x1dc   : > { %v2507_v35 = vpop.eup %2506  ;;  %v1495_v37 = vmul.f32 1.442695, %v1476_v4 }
 0x1dd   : > { %v2509_v27 = vpop.eup %2508  ;;  %v1411_v29 = vpop.f32.mrf.mxu3  ;;  %v1523_v41 = vadd.f32 1.0, %v2507_v35 }
 0x1de   : > { %2510 = vpow2.f32 %v1495_v37  ;;  %v3331_v7 = vadd.f32 %v1411_v29, %v1363_v42  ;;  %v1540_v39 = vmul.f32 0.6931472, %v2509_v27  ;;  %v1374_v42 = vpop.f32.mrf.mxu2 }
 0x1df   : > { %2512 = vlog2.f32 %v1523_v41  ;;  %v1821_v41 = vld [vmem:[#allocation10 + $0x50] sm:$0xff] }
 0x1e0   : > { %v1461_v3 = vand.u32 2147483647, %v3331_v7  ;;  %1710 = vmatmul.f32.gmra.mxu1 %v3331_v7  ;;  %v1570_v33 = vadd.f32 %v1540_v39, %v1442_v31  ;;  %v1445_v27 = vmax.f32 %v3331_v7, 0.0  ;;  %v1279_v31 = vpop.f32.mrf.mxu0  ;;  %1832 = vmatpush.msra.mxu2 %v1821_v41  ;;  %v1324_v39 = vadd.f32 %v1323_v55, %v1275_v26 }
 0x1e1   : > { %v1277_v7 = vadd.f32 %v1276_v40, %v3278_v11  ;;  %v1819_v40 = vld [vmem:[#allocation10 + $0x40] sm:$0xff] }
 0x1e2   : > { %v1477_v44 = vsub.f32 0.0, %v1461_v3  ;;  %1620 = vmatmul.f32.gmra.mxu0 %v1570_v33  ;;  %v1328_v3 = vpop.f32.mrf.mxu1  ;;  %v1373_v43 = vadd.f32 %v1372_v46, %v1324_v39 }
 0x1e4   : > { %v2511_v1 = vpop.eup %2510  ;;  %v1497_v50 = vmul.f32 1.442695, %v1477_v44 }
 0x1e5   : > { %v2513_v14 = vpop.eup %2512  ;;  %v1413_v53 = vpop.f32.mrf.mxu3  ;;  %v1524_v54 = vadd.f32 1.0, %v2511_v1 }
 0x1e6   : > { %2514 = vpow2.f32 %v1497_v50  ;;  %v3337_v5 = vadd.f32 %v1413_v53, %v1365_v52  ;;  %v1542_v63 = vmul.f32 0.6931472, %v2513_v14  ;;  %v1820_v53 = vld [vmem:[#allocation10 + $0x48] sm:$0xff] }
 0x1e7   : > { %2516 = vlog2.f32 %v1524_v54  ;;  %v1377_v54 = vpop.f32.mrf.mxu2  ;;  %1833 = vmatpush.msra.mxu2 %v1820_v53 }
 0x1e8   : > { %v1462_v17 = vand.u32 2147483647, %v3337_v5  ;;  %1713 = vmatmul.f32.gmra.mxu1 %v3337_v5  ;;  %v1571_v48 = vadd.f32 %v1542_v63, %v1443_v16  ;;  %v1446_v38 = vmax.f32 %v3337_v5, 0.0  ;;  %v1326_v16 = vadd.f32 %v1325_v51, %v1277_v7  ;;  %v1281_v57 = vpop.f32.mrf.mxu0 }
 0x1e9   : > { %v1280_v5 = vadd.f32 %v1279_v31, %v3283_v23  ;;  %1834 = vmatpush.msra.mxu2 %v1819_v40 }
 0x1ea   : > { %v1478_v13 = vsub.f32 0.0, %v1462_v17  ;;  %1623 = vmatmul.f32.gmra.mxu0 %v1571_v48  ;;  %v1375_v17 = vadd.f32 %v1374_v42, %v1326_v16  ;;  %v1330_v46 = vpop.f32.mrf.mxu1 }
 0x1ec   : > { %v2515_v2 = vpop.eup %2514  ;;  %v1499_v15 = vmul.f32 1.442695, %v1478_v13 }
 0x1ed   : > { %v2517_v34 = vpop.eup %2516  ;;  %v1416_v56 = vpop.f32.mrf.mxu3  ;;  %v1525_v12 = vadd.f32 1.0, %v2515_v2 }
 0x1ee   : > { %2518 = vpow2.f32 %v1499_v15  ;;  %v3343_v6 = vadd.f32 %v1416_v56, %v1368_v8  ;;  %v1544_v20 = vmul.f32 0.6931472, %v2517_v34  ;;  %v1329_v56 = vadd.f32 %v1328_v3, %v1280_v5  ;;  %v1816_v5 = vld [vmem:[#allocation10 + $0x28] sm:$0xff] }
 0x1ef   : > { %2520 = vlog2.f32 %v1525_v12 }
 0x1f0   : > { %v1463_v10 = vand.u32 2147483647, %v3343_v6  ;;  %1716 = vmatmul.f32.gmra.mxu1 %v3343_v6  ;;  %v1572_v47 = vadd.f32 %v1544_v20, %v1444_v58  ;;  %v1447_v61 = vmax.f32 %v3343_v6, 0.0  ;;  %v1379_v58 = vpop.f32.mrf.mxu2  ;;  %v1284_v21 = vpop.f32.mrf.mxu0  ;;  %v1282_v6 = vadd.f32 %v1281_v57, %v3290_v59 }
 0x1f2   : > { %v1479_v28 = vsub.f32 0.0, %v1463_v10  ;;  %1626 = vmatmul.f32.gmra.mxu0 %v1572_v47  ;;  %v1378_v10 = vadd.f32 %v1377_v54, %v1329_v56  ;;  %v1333_v42 = vpop.f32.mrf.mxu1 }
 0x1f4   : > { %v2519_v22 = vpop.eup %2518  ;;  %v1501_v4 = vmul.f32 1.442695, %v1479_v28 }
 0x1f5   : > { %v2521_v35 = vpop.eup %2520  ;;  %v1418_v30 = vpop.f32.mrf.mxu3  ;;  %v1526_v37 = vadd.f32 1.0, %v2519_v22 }
 0x1f6   : > { %2522 = vpow2.f32 %v1501_v4  ;;  %v3349_v49 = vadd.f32 %v1418_v30, %v1370_v25  ;;  %v1546_v29 = vmul.f32 0.6931472, %v2521_v35  ;;  %v1818_v35 = vld [vmem:[#allocation10 + $0x38] sm:$0xff]  ;;  %v1331_v30 = vadd.f32 %v1330_v46, %v1282_v6 }
 0x1f7   : > { %2524 = vlog2.f32 %v1526_v37  ;;  %1835 = vmatpush.msra.mxu2 %v1818_v35 }
 0x1f8   : > { %v1464_v36 = vand.u32 2147483647, %v3349_v49  ;;  %1719 = vmatmul.f32.gmra.mxu1 %v3349_v49  ;;  %v1573_v32 = vadd.f32 %v1546_v29, %v1445_v27  ;;  %v1448_v25 = vmax.f32 %v3349_v49, 0.0  ;;  %v1382_v29 = vpop.f32.mrf.mxu2  ;;  %v1380_v31 = vadd.f32 %v1379_v58, %v1331_v30 }
 0x1f9   : > { %v1285_v49 = vadd.f32 %v1284_v21, %v3296_v19 }
 0x1fa   : > { %v1480_v24 = vsub.f32 0.0, %v1464_v36  ;;  %1629 = vmatmul.f32.gmra.mxu0 %v1573_v32  ;;  %v1286_v32 = vpop.f32.mrf.mxu0 }
 0x1fc   : > { %v2523_v33 = vpop.eup %2522  ;;  %v1503_v44 = vmul.f32 1.442695, %v1480_v24 }
 0x1fd   : > { %v2525_v45 = vpop.eup %2524  ;;  %v1421_v1 = vpop.f32.mrf.mxu3  ;;  %v1527_v52 = vadd.f32 1.0, %v2523_v33 }
 0x1fe   : > { %2526 = vpow2.f32 %v1503_v44  ;;  %v3355_v50 = vadd.f32 %v1421_v1, %v1373_v43  ;;  %v1548_v14 = vmul.f32 0.6931472, %v2525_v45  ;;  %v1817_v44 = vld [vmem:[#allocation10 + $0x30] sm:$0xff]  ;;  %v1334_v45 = vadd.f32 %v1333_v42, %v1285_v49 }
 0x1ff   : > { %2528 = vlog2.f32 %v1527_v52  ;;  %1836 = vmatpush.msra.mxu2 %v1817_v44  ;;  %v1335_v52 = vpop.f32.mrf.mxu1 }
 0x200   : > { %v1465_v63 = vand.u32 2147483647, %v3355_v50  ;;  %1722 = vmatmul.f32.gmra.mxu1 %v3355_v50  ;;  %v1574_v11 = vadd.f32 %v1548_v14, %v1446_v38  ;;  %v1449_v33 = vmax.f32 %v3355_v50, 0.0  ;;  %v1383_v53 = vadd.f32 %v1382_v29, %v1334_v45 }
 0x201   : > { %v1287_v50 = vadd.f32 %v1286_v32, %v3304_v0  ;;  %1837 = vmatpush.msra.mxu2 %v1816_v5 }
 0x202   : > { %v1481_v55 = vsub.f32 0.0, %v1465_v63  ;;  %1632 = vmatmul.f32.gmra.mxu0 %v1574_v11  ;;  %v1384_v63 = vpop.f32.mrf.mxu2 }
 0x203   : > { %v1336_v46 = vadd.f32 %v1335_v52, %v1287_v50 }
 0x204   : > { %v2527_v62 = vpop.eup %2526  ;;  %v1505_v48 = vmul.f32 1.442695, %v1481_v55 }
 0x205   : > { %v2529_v13 = vpop.eup %2528  ;;  %v1423_v2 = vpop.f32.mrf.mxu3  ;;  %v1528_v8 = vadd.f32 1.0, %v2527_v62 }
 0x206   : > { %2530 = vpow2.f32 %v1505_v48  ;;  %v3361_v15 = vadd.f32 %v1423_v2, %v1375_v17  ;;  %v1550_v34 = vmul.f32 0.6931472, %v2529_v13  ;;  %v1815_v48 = vld [vmem:[#allocation10 + $0x20] sm:$0xff]  ;;  %v1289_v13 = vpop.f32.mrf.mxu0 }
 0x207   : > { %2532 = vlog2.f32 %v1528_v8  ;;  %1838 = vmatpush.msra.mxu2 %v1815_v48  ;;  %v1290_v40 = vadd.f32 %v1289_v13, %v3308_v9 }
 0x208   : > { %v1466_v12 = vand.u32 2147483647, %v3361_v15  ;;  %1725 = vmatmul.f32.gmra.mxu1 %v3361_v15  ;;  %v1575_v23 = vadd.f32 %v1550_v34, %v1447_v61  ;;  %v1450_v55 = vmax.f32 %v3361_v15, 0.0  ;;  %v1338_v61 = vpop.f32.mrf.mxu1  ;;  %v1385_v34 = vadd.f32 %v1384_v63, %v1336_v46 }
 0x20a   : > { %v1482_v20 = vsub.f32 0.0, %v1466_v12  ;;  %1635 = vmatmul.f32.gmra.mxu0 %v1575_v23  ;;  %v1387_v6 = vpop.f32.mrf.mxu2 }
 0x20c   : > { %v2531_v18 = vpop.eup %2530  ;;  %v1507_v47 = vmul.f32 1.442695, %v1482_v20  ;;  %v1814_v20 = vld [vmem:[#allocation10 + $0x18] sm:$0xff] }
 0x20d   : > { %v2533_v51 = vpop.eup %2532  ;;  %v1426_v28 = vpop.f32.mrf.mxu3  ;;  %v1529_v22 = vadd.f32 1.0, %v2531_v18  ;;  %1839 = vmatpush.msra.mxu2 %v1814_v20 }
 0x20e   : > { %2534 = vpow2.f32 %v1507_v47  ;;  %v3367_v26 = vadd.f32 %v1426_v28, %v1378_v10  ;;  %v1552_v4 = vmul.f32 0.6931472, %v2533_v51  ;;  %v1339_v47 = vadd.f32 %v1338_v61, %v1290_v40  ;;  %v1291_v28 = vpop.f32.mrf.mxu0 }
 0x20f   : > { %2536 = vlog2.f32 %v1529_v22 }
 0x210   : > { %v1467_v37 = vand.u32 2147483647, %v3367_v26  ;;  %1728 = vmatmul.f32.gmra.mxu1 %v3367_v26  ;;  %v1576_v59 = vadd.f32 %v1552_v4, %v1448_v25  ;;  %v1451_v21 = vmax.f32 %v3367_v26, 0.0  ;;  %v1388_v4 = vadd.f32 %v1387_v6, %v1339_v47  ;;  %v1340_v30 = vpop.f32.mrf.mxu1 }
 0x211   : > { %v1292_v26 = vadd.f32 %v1291_v28, %v3311_v60 }
 0x212   : > { %v1483_v27 = vsub.f32 0.0, %v1467_v37  ;;  %1638 = vmatmul.f32.gmra.mxu0 %v1576_v59  ;;  %v1389_v32 = vpop.f32.mrf.mxu2 }
 0x213   : > { %v1341_v49 = vadd.f32 %v1340_v30, %v1292_v26 }
 0x214   : > { %v2535_v41 = vpop.eup %2534  ;;  %v1509_v39 = vmul.f32 1.442695, %v1483_v27  ;;  %v1813_v27 = vld [vmem:[#allocation10 + $0x10] sm:$0xff] }
 0x215   : > { %v2537_v36 = vpop.eup %2536  ;;  %v1428_v24 = vpop.f32.mrf.mxu3  ;;  %v1530_v3 = vadd.f32 1.0, %v2535_v41  ;;  %1840 = vmatpush.msra.mxu2 %v1813_v27 }
 0x216   : > { %2538 = vpow2.f32 %v1509_v39  ;;  %v3373_v43 = vadd.f32 %v1428_v24, %v1380_v31  ;;  %v1554_v7 = vmul.f32 0.6931472, %v2537_v36 }
 0x217   : > { %2540 = vlog2.f32 %v1530_v3  ;;  %v1390_v3 = vadd.f32 %v1389_v32, %v1341_v49 }
 0x218   : > { %v1468_v1 = vand.u32 2147483647, %v3373_v43  ;;  %1731 = vmatmul.f32.gmra.mxu1 %v3373_v43  ;;  %v1577_v19 = vadd.f32 %v1554_v7, %v1449_v33  ;;  %v1452_v29 = vmax.f32 %v3373_v43, 0.0 }
 0x21a   : > { %v1484_v38 = vsub.f32 0.0, %v1468_v1  ;;  %1641 = vmatmul.f32.gmra.mxu0 %v1577_v19  ;;  %v1812_v1 = vld [vmem:[#allocation10 + $0x8] sm:$0xff] }
 0x21b   : > { %1841 = vmatpush.msra.mxu2 %v1812_v1 }
 0x21c   : > { %v2539_v14 = vpop.eup %2538  ;;  %v1511_v54 = vmul.f32 1.442695, %v1484_v38 }
 0x21d   : > { %v2541_v16 = vpop.eup %2540  ;;  %v1431_v11 = vpop.f32.mrf.mxu3  ;;  %v1531_v57 = vadd.f32 1.0, %v2539_v14 }
 0x21e   : > { %2542 = vpow2.f32 %v1511_v54  ;;  %v3379_v62 = vadd.f32 %v1431_v11, %v1383_v53  ;;  %v1556_v17 = vmul.f32 0.6931472, %v2541_v16 }
 0x21f   : > { %2544 = vlog2.f32 %v1531_v57 }
 0x220   : > { %v1469_v2 = vand.u32 2147483647, %v3379_v62  ;;  %1734 = vmatmul.f32.gmra.mxu1 %v3379_v62  ;;  %v1578_v0 = vadd.f32 %v1556_v17, %v1450_v55  ;;  %v1453_v43 = vmax.f32 %v3379_v62, 0.0  ;;  %v1811_v62 = vld [vmem:[#allocation10] sm:$0xff] }
 0x221   : > { %1842 = vmatpush.msra.mxu2 %v1811_v62 }
 0x222   : > { %v1485_v8 = vsub.f32 0.0, %v1469_v2  ;;  %1644 = vmatmul.f32.gmra.mxu0 %v1578_v0 }
 0x224   : > { %v2543_v15 = vpop.eup %2542  ;;  %v1513_v56 = vmul.f32 1.442695, %v1485_v8 }
 0x225   : > { %v2545_v12 = vpop.eup %2544  ;;  %v1433_v23 = vpop.f32.mrf.mxu3  ;;  %v1532_v58 = vadd.f32 1.0, %v2543_v15 }
 0x226   : > { %2546 = vpow2.f32 %v1513_v56  ;;  %v3385_v18 = vadd.f32 %v1433_v23, %v1385_v34  ;;  %v1558_v10 = vmul.f32 0.6931472, %v2545_v12 }
 0x227   : > { %2548 = vlog2.f32 %v1532_v58 }
 0x228   : > { %v1470_v51 = vand.u32 2147483647, %v3385_v18  ;;  %1737 = vmatmul.f32.gmra.mxu1 %v3385_v18  ;;  %v1579_v9 = vadd.f32 %v1558_v10, %v1451_v21  ;;  %v1454_v57 = vmax.f32 %v3385_v18, 0.0 }
 0x22a   : > { %v1486_v22 = vsub.f32 0.0, %v1470_v51  ;;  %1647 = vmatmul.f32.gmra.mxu0 %v1579_v9 }
 0x22c   : > { %v2547_v25 = vpop.eup %2546  ;;  %v1515_v35 = vmul.f32 1.442695, %v1486_v22 }
 0x22d   : > { %v2549_v42 = vpop.eup %2548  ;;  %v1436_v37 = vpop.f32.mrf.mxu3  ;;  %v1533_v59 = vadd.f32 1.0, %v2547_v25 }
 0x22e   : > { %2550 = vpow2.f32 %v1515_v35  ;;  %v1437_v41 = vadd.f32 %v1436_v37, %v1388_v4  ;;  %v1560_v31 = vmul.f32 0.6931472, %v2549_v42 }
 0x22f   : > { %2552 = vlog2.f32 %v1533_v59 }
 0x230   : > { %v1471_v39 = vand.u32 2147483647, %v1437_v41  ;;  %1740 = vmatmul.f32.gmra.mxu1 %v1437_v41  ;;  %v1580_v36 = vadd.f32 %v1560_v31, %v1452_v29  ;;  %v1455_v2 = vmax.f32 %v1437_v41, 0.0 }
 0x232   : > { %v1487_v24 = vsub.f32 0.0, %v1471_v39  ;;  %1650 = vmatmul.f32.gmra.mxu0 %v1580_v36 }
 0x234   : > { %v2551_v60 = vpop.eup %2550  ;;  %v1517_v33 = vmul.f32 1.442695, %v1487_v24 }
 0x235   : > { %v2553_v7 = vpop.eup %2552  ;;  %v1438_v44 = vpop.f32.mrf.mxu3  ;;  %v1534_v45 = vadd.f32 1.0, %v2551_v60 }
 0x236   : > { %2554 = vpow2.f32 %v1517_v33  ;;  %v1439_v19 = vadd.f32 %v1438_v44, %v1390_v3  ;;  %v1562_v52 = vmul.f32 0.6931472, %v2553_v7 }
 0x237   : > { %2556 = vlog2.f32 %v1534_v45 }
 0x238   : > { %v1472_v38 = vand.u32 2147483647, %v1439_v19  ;;  %1743 = vmatmul.f32.gmra.mxu1 %v1439_v19  ;;  %v1581_v14 = vadd.f32 %v1562_v52, %v1453_v43  ;;  %v1456_v34 = vmax.f32 %v1439_v19, 0.0 }
 0x23a   : > { %v1488_v53 = vsub.f32 0.0, %v1472_v38  ;;  %1653 = vmatmul.f32.gmra.mxu0 %v1581_v14 }
 0x23c   : > { %v2555_v50 = vpop.eup %2554  ;;  %v1519_v54 = vmul.f32 1.442695, %v1488_v53 }
 0x23d   : > { %v2557_v16 = vpop.eup %2556  ;;  %v1699_v63 = vpop.f32.mrf.mxu1  ;;  %v1535_v11 = vadd.f32 1.0, %v2555_v50 }
 0x23e   : > { %2558 = vpow2.f32 %v1519_v54  ;;  %v1564_v55 = vmul.f32 0.6931472, %v2557_v16 }
 0x23f   : > { %2560 = vlog2.f32 %v1535_v11 }
 0x240   : > { %v1582_v17 = vadd.f32 %v1564_v55, %v1454_v57 }
 0x242   : > { %1656 = vmatmul.f32.gmra.mxu0 %v1582_v17 }
 0x244   : > { %v2559_v5 = vpop.eup %2558 }
 0x245   : > { %v2561_v48 = vpop.eup %2560  ;;  %v1702_v13 = vpop.f32.mrf.mxu1  ;;  %v1536_v46 = vadd.f32 1.0, %v2559_v5 }
 0x246   : > { %v1566_v0 = vmul.f32 0.6931472, %v2561_v48 }
 0x247   : > { %2562 = vlog2.f32 %v1536_v46 }
 0x248   : > { %v1583_v8 = vadd.f32 %v1566_v0, %v1455_v2 }
 0x24a   : > { %1659 = vmatmul.f32.gmra.mxu0 %v1583_v8 }
 0x24d   : > { %v2563_v61 = vpop.eup %2562  ;;  %v1705_v15 = vpop.f32.mrf.mxu1 }
 0x24e   : > { %v1568_v40 = vmul.f32 0.6931472, %v2563_v61 }
 0x250   : > { %v1584_v56 = vadd.f32 %v1568_v40, %v1456_v34 }
 0x252   : > { %1662 = vmatmul.f32.gmra.mxu0 %v1584_v56 }
 0x255   : > { %v1708_v12 = vpop.f32.mrf.mxu1 }
 0x257   : > { %v1618_v23 = vpop.f32.mrf.mxu0 }
 0x258   : > { %v1747_v58 = vsub.f32 %v1618_v23, %v1699_v63 }
 0x25a   : > { %v1763_v20 = vsub.f32 0.0, %v1747_v58 }
 0x25c   : > { %v1779_v21 = vmul.f32 1.442695, %v1763_v20 }
 0x25d   : > { %v1711_v6 = vpop.f32.mrf.mxu1 }
 0x25e   : > { %2564 = vpow2.f32 %v1779_v21 }
 0x25f   : > { %v1621_v18 = vpop.f32.mrf.mxu0 }
 0x260   : > { %v1748_v10 = vsub.f32 %v1621_v18, %v1702_v13 }
 0x262   : > { %v1764_v47 = vsub.f32 0.0, %v1748_v10 }
 0x264   : > { %v2565_v51 = vpop.eup %2564  ;;  %v1781_v9 = vmul.f32 1.442695, %v1764_v47 }
 0x265   : > { %1843 = vmatmul.f32.vlgmr.msra.gmra.mxu2 %v2565_v51  ;;  %v1714_v4 = vpop.f32.mrf.mxu1 }
 0x266   : > { %2566 = vpow2.f32 %v1781_v9 }
 0x267   : > { %v1624_v28 = vpop.f32.mrf.mxu0 }
 0x268   : > { %v1749_v22 = vsub.f32 %v1624_v28, %v1705_v15 }
 0x26a   : > { %v1765_v25 = vsub.f32 0.0, %v1749_v22 }
 0x26c   : > { %v2567_v26 = vpop.eup %2566  ;;  %v1783_v35 = vmul.f32 1.442695, %v1765_v25 }
 0x26d   : > { %1846 = vmatmul.f32.gmra.mxu2 %v2567_v26  ;;  %v1717_v29 = vpop.f32.mrf.mxu1 }
 0x26e   : > { %2568 = vpow2.f32 %v1783_v35 }
 0x26f   : > { %v1627_v42 = vpop.f32.mrf.mxu0 }
 0x270   : > { %v1750_v30 = vsub.f32 %v1627_v42, %v1708_v12 }
 0x272   : > { %v1766_v37 = vsub.f32 0.0, %v1750_v30 }
 0x274   : > { %v2569_v59 = vpop.eup %2568  ;;  %v1785_v27 = vmul.f32 1.442695, %v1766_v37 }
 0x275   : > { %1849 = vmatmul.f32.gmra.mxu2 %v2569_v59  ;;  %v1720_v32 = vpop.f32.mrf.mxu1 }
 0x276   : > { %2570 = vpow2.f32 %v1785_v27 }
 0x277   : > { %v1630_v41 = vpop.f32.mrf.mxu0 }
 0x278   : > { %v1751_v31 = vsub.f32 %v1630_v41, %v1711_v6 }
 0x27a   : > { %v1767_v49 = vsub.f32 0.0, %v1751_v31 }
 0x27c   : > { %v2571_v39 = vpop.eup %2570  ;;  %v1787_v36 = vmul.f32 1.442695, %v1767_v49 }
 0x27d   : > { %1852 = vmatmul.f32.gmra.mxu2 %v2571_v39  ;;  %v1723_v1 = vpop.f32.mrf.mxu1 }
 0x27e   : > { %2572 = vpow2.f32 %v1787_v36 }
 0x27f   : > { %v1633_v24 = vpop.f32.mrf.mxu0 }
 0x280   : > { %v1752_v60 = vsub.f32 %v1633_v24, %v1714_v4 }
 0x282   : > { %v1768_v3 = vsub.f32 0.0, %v1752_v60 }
 0x284   : > { %v2573_v33 = vpop.eup %2572  ;;  %v1789_v7 = vmul.f32 1.442695, %v1768_v3 }
 0x285   : > { %1855 = vmatmul.f32.gmra.mxu2 %v2573_v33  ;;  %v1726_v50 = vpop.f32.mrf.mxu1 }
 0x286   : > { %2574 = vpow2.f32 %v1789_v7 }
 0x287   : > { %v1636_v44 = vpop.f32.mrf.mxu0 }
 0x288   : > { %v1753_v45 = vsub.f32 %v1636_v44, %v1717_v29 }
 0x28a   : > { %v1769_v43 = vsub.f32 0.0, %v1753_v45 }
 0x28c   : > { %v2575_v19 = vpop.eup %2574  ;;  %v1791_v52 = vmul.f32 1.442695, %v1769_v43 }
 0x28d   : > { %1858 = vmatmul.f32.gmra.mxu2 %v2575_v19  ;;  %v1729_v17 = vpop.f32.mrf.mxu1 }
 0x28e   : > { %2576 = vpow2.f32 %v1791_v52 }
 0x28f   : > { %v1639_v38 = vpop.f32.mrf.mxu0 }
 0x290   : > { %v1754_v14 = vsub.f32 %v1639_v38, %v1720_v32 }
 0x292   : > { %v1770_v53 = vsub.f32 0.0, %v1754_v14 }
 0x294   : > { %v2577_v54 = vpop.eup %2576  ;;  %v1793_v16 = vmul.f32 1.442695, %v1770_v53 }
 0x295   : > { %1861 = vmatmul.f32.gmra.mxu2 %v2577_v54  ;;  %v1732_v0 = vpop.f32.mrf.mxu1 }
 0x296   : > { %2578 = vpow2.f32 %v1793_v16 }
 0x297   : > { %v1642_v63 = vpop.f32.mrf.mxu0 }
 0x298   : > { %v1755_v11 = vsub.f32 %v1642_v63, %v1723_v1 }
 0x29a   : > { %v1771_v57 = vsub.f32 0.0, %v1755_v11 }
 0x29c   : > { %v2579_v55 = vpop.eup %2578  ;;  %v1795_v62 = vmul.f32 1.442695, %v1771_v57 }
 0x29d   : > { %1864 = vmatmul.f32.gmra.mxu2 %v2579_v55  ;;  %v1735_v23 = vpop.f32.mrf.mxu1 }
 0x29e   : > { %2580 = vpow2.f32 %v1795_v62 }
 0x29f   : > { %v1645_v5 = vpop.f32.mrf.mxu0 }
 0x2a0   : > { %v1756_v48 = vsub.f32 %v1645_v5, %v1726_v50 }
 0x2a2   : > { %v1772_v13 = vsub.f32 0.0, %v1756_v48 }
 0x2a4   : > { %v2581_v46 = vpop.eup %2580  ;;  %v1797_v2 = vmul.f32 1.442695, %v1772_v13 }
 0x2a5   : > { %1867 = vmatmul.f32.gmra.mxu2 %v2581_v46  ;;  %v1738_v47 = vpop.f32.mrf.mxu1 }
 0x2a6   : > { %2582 = vpow2.f32 %v1797_v2 }
 0x2a7   : > { %v1648_v8 = vpop.f32.mrf.mxu0 }
 0x2a8   : > { %v1757_v61 = vsub.f32 %v1648_v8, %v1729_v17 }
 0x2aa   : > { %v1773_v15 = vsub.f32 0.0, %v1757_v61 }
 0x2ac   : > { %v2583_v34 = vpop.eup %2582  ;;  %v1799_v40 = vmul.f32 1.442695, %v1773_v15 }
 0x2ad   : > { %1870 = vmatmul.f32.gmra.mxu2 %v2583_v34  ;;  %v1741_v35 = vpop.f32.mrf.mxu1 }
 0x2ae   : > { %2584 = vpow2.f32 %v1799_v40 }
 0x2af   : > { %v1651_v56 = vpop.f32.mrf.mxu0 }
 0x2b0   : > { %v1758_v12 = vsub.f32 %v1651_v56, %v1732_v0 }
 0x2b2   : > { %v1774_v58 = vsub.f32 0.0, %v1758_v12 }
 0x2b4   : > { %v2585_v20 = vpop.eup %2584  ;;  %v1801_v21 = vmul.f32 1.442695, %v1774_v58 }
 0x2b5   : > { %1873 = vmatmul.f32.gmra.mxu2 %v2585_v20  ;;  %v1744_v29 = vpop.f32.mrf.mxu1 }
 0x2b6   : > { %2586 = vpow2.f32 %v1801_v21 }
 0x2b7   : > { %v1654_v18 = vpop.f32.mrf.mxu0 }
 0x2b8   : > { %v1759_v10 = vsub.f32 %v1654_v18, %v1735_v23 }
 0x2ba   : > { %v1775_v6 = vsub.f32 0.0, %v1759_v10 }
 0x2bc   : > { %v2587_v51 = vpop.eup %2586  ;;  %v1803_v9 = vmul.f32 1.442695, %v1775_v6 }
 0x2bd   : > { %1876 = vmatmul.f32.gmra.mxu2 %v2587_v51 }
 0x2be   : > { %2588 = vpow2.f32 %v1803_v9 }
 0x2bf   : > { %v1657_v28 = vpop.f32.mrf.mxu0 }
 0x2c0   : > { %v1760_v22 = vsub.f32 %v1657_v28, %v1738_v47 }
 0x2c2   : > { %v1776_v25 = vsub.f32 0.0, %v1760_v22 }
 0x2c4   : > { %v2589_v4 = vpop.eup %2588  ;;  %v1805_v26 = vmul.f32 1.442695, %v1776_v25 }
 0x2c5   : > { %1879 = vmatmul.f32.gmra.mxu2 %v2589_v4 }
 0x2c6   : > { %2590 = vpow2.f32 %v1805_v26 }
 0x2c7   : > { %v1660_v42 = vpop.f32.mrf.mxu0 }
 0x2c8   : > { %v1761_v30 = vsub.f32 %v1660_v42, %v1741_v35 }
 0x2ca   : > { %v1777_v37 = vsub.f32 0.0, %v1761_v30 }
 0x2cc   : > { %v2591_v59 = vpop.eup %2590  ;;  %v1807_v27 = vmul.f32 1.442695, %v1777_v37 }
 0x2cd   : > { %1882 = vmatmul.f32.gmra.mxu2 %v2591_v59 }
 0x2ce   : > { %2592 = vpow2.f32 %v1807_v27 }
 0x2cf   : > { %v1663_v41 = vpop.f32.mrf.mxu0 }
 0x2d0   : > { %v1762_v31 = vsub.f32 %v1663_v41, %v1744_v29 }
 0x2d2   : > { %v1778_v49 = vsub.f32 0.0, %v1762_v31 }
 0x2d4   : > { %v2593_v39 = vpop.eup %2592  ;;  %v1809_v36 = vmul.f32 1.442695, %v1778_v49 }
 0x2d5   : > { %1885 = vmatmul.f32.gmra.mxu2 %v2593_v39 }
 0x2d6   : > { %2594 = vpow2.f32 %v1809_v36 }
 0x2dc   : > { %v2595_v32 = vpop.eup %2594 }
 0x2dd   : > { %1888 = vmatmul.f32.gmra.mxu2 %v2595_v32 }
 0x2e8   : > { %v1844_v24 = vpop.f32.mrf.mxu2 }
 0x2e9   : > { %1892 = vst [vmem:[%s3394_s16] sm:$0xff] %v1844_v24 }
 0x2f0   : > { %v1847_v60 = vpop.f32.mrf.mxu2 }
 0x2f1   : > { %1893 = vst [vmem:[%s3394_s16 + $0x8] sm:$0xff] %v1847_v60 }
 0x2f8   : > { %v1850_v3 = vpop.f32.mrf.mxu2 }
 0x2f9   : > { %1894 = vst [vmem:[%s3394_s16 + $0x10] sm:$0xff] %v1850_v3 }
 0x300   : > { %v1853_v33 = vpop.f32.mrf.mxu2 }
 0x301   : > { %1895 = vst [vmem:[%s3394_s16 + $0x18] sm:$0xff] %v1853_v33 }
 0x308   : > { %v1856_v7 = vpop.f32.mrf.mxu2 }
 0x309   : > { %1896 = vst [vmem:[%s3394_s16 + $0x20] sm:$0xff] %v1856_v7 }
 0x310   : > { %v1859_v44 = vpop.f32.mrf.mxu2 }
 0x311   : > { %1897 = vst [vmem:[%s3394_s16 + $0x28] sm:$0xff] %v1859_v44 }
 0x318   : > { %v1862_v45 = vpop.f32.mrf.mxu2 }
 0x319   : > { %1898 = vst [vmem:[%s3394_s16 + $0x30] sm:$0xff] %v1862_v45 }
 0x320   : > { %v1865_v1 = vpop.f32.mrf.mxu2 }
 0x321   : > { %1899 = vst [vmem:[%s3394_s16 + $0x38] sm:$0xff] %v1865_v1 }
 0x328   : > { %v1868_v43 = vpop.f32.mrf.mxu2 }
 0x329   : > { %1900 = vst [vmem:[%s3394_s16 + $0x40] sm:$0xff] %v1868_v43 }
 0x330   : > { %v1871_v19 = vpop.f32.mrf.mxu2 }
 0x331   : > { %1901 = vst [vmem:[%s3394_s16 + $0x48] sm:$0xff] %v1871_v19 }
 0x338   : > { %v1874_v52 = vpop.f32.mrf.mxu2 }
 0x339   : > { %1902 = vst [vmem:[%s3394_s16 + $0x50] sm:$0xff] %v1874_v52 }
 0x340   : > { %v1877_v38 = vpop.f32.mrf.mxu2 }
 0x341   : > { %1903 = vst [vmem:[%s3394_s16 + $0x58] sm:$0xff] %v1877_v38 }
 0x348   : > { %v1880_v14 = vpop.f32.mrf.mxu2 }
 0x349   : > { %1904 = vst [vmem:[%s3394_s16 + $0x60] sm:$0xff] %v1880_v14 }
 0x350   : > { %v1883_v53 = vpop.f32.mrf.mxu2 }
 0x351   : > { %1905 = vst [vmem:[%s3394_s16 + $0x68] sm:$0xff] %v1883_v53 }
 0x358   : > { %v1886_v50 = vpop.f32.mrf.mxu2 }
 0x359   : > { %1906 = vst [vmem:[%s3394_s16 + $0x70] sm:$0xff] %v1886_v50 }
 0x360   : > { %v1889_v54 = vpop.f32.mrf.mxu2 }
 0x361   : > { %1907 = vst [vmem:[%s3394_s16 + $0x78] sm:$0xff] %v1889_v54 }
 0x362   : > { %2773 = shalt.err (!%p2770_p10)
}
 0x363   : > { %s2831_s29 = smov 128   ;;  %s2832_s16 = smov 8  }
 0x364   : > { %2423 = dma.vmem_to_hbm [thread:$0]  (%p2954_p3), %s1922_s10, 2048, %s1924_s7, %s1909_s12, %s2831_s29, %s2831_s29, %s2832_s16  }
 0x365 PF: > { %s1938_s17 = sand.u32 1, %s2808_s21   ;;  %p3461_p12 = scmp.ge.s32.totalorder %s2820_s24, 2 }
 0x366   : > { %s1939_s18 = scalar_lea.sflag [#allocation4], %s1938_s17 }
 0x367   : > { %p2443_p13 = pnand %p3461_p12, %p2903_p6 }
 0x369   : > { %p2444_p0 = pneg %p2443_p13 }
 0x36b   : > { %2803 = dma.done.wait (%p2444_p0), %s1939_s18, 2048  }
 0x36c   : > { %2805 = vsyncadd (%p2444_p0), %s1939_s18, 4294965248  ;;  %p21_p5 = scmp.ge.s32.totalorder %s2944_s14, 4   ;;  %s3462_s21 = smov %s2812_s22 }
 0x36d   : > { %s3463_s22 = smov %s2816_s23  ;;  %s3464_s23 = smov %s2960_s26 }
 0x36e   : > { %s3465_s24 = smov %s2944_s14  ;;  %23 = sbr.rel (!%p21_p5) target bundleno = 7 (0x7), region = 105 }
 0x373   :  { %1945 = vsyncpa [#allocation3], 1 }
 0x374   :  { %1947 = vsyncpa [#allocation3 + $0x1], 1 }
 0x375   :  { %1948 = vsyncpa [#allocation6], 1 }
 0x376   :  { %1949 = vsyncpa [#allocation9], 1 }
 0x377   :  { %1950 = vsyncpa [#allocation4], 1 }
 0x378   :  { %1952 = vsyncpa [#allocation4 + $0x1], 1 }

</bundles_post_ra>
